<compile_context>
chip_gen: v7x
topology: tpu7x:2x2x1
jax: 0.10.0
libtpu: 0.0.40
codegen_flags: <defaults>
</compile_context>

<pallas_src>
import jax
import jax.numpy as jnp
from jax import lax
from jax.experimental import pallas as pl
from jax.experimental.pallas import tpu as pltpu

LN_EPS = 1e-5
_LANE = 128   # lane width; row tiles and batch padding are multiples of this


def _layernorm(h, gamma, beta):
    # f32 LayerNorm with biased variance (matches torch.nn.LayerNorm).
    mu = jnp.mean(h, axis=-1, keepdims=True)
    var = jnp.mean((h - mu) ** 2, axis=-1, keepdims=True)
    return (h - mu) * lax.rsqrt(var + LN_EPS) * gamma + beta


def _behavior_discriminator_kernel(
    rnn_ref,      # [TB, rnn_dim]   compute dtype (f32 or bf16)
    act_ref,      # [TB, act_dim]   compute dtype
    label_ref,    # [TB, latent]    f32
    mask_ref,     # [TB, 1]         f32 (zero for padded rows)
    eye_ref,      # [128, 128]      f32 identity (VMEM-resident)
    w1r_ref, w1a_ref, b1_ref, g1_ref, be1_ref,   # layer 1: Linear + LayerNorm
    w2_ref, b2_ref, g2_ref, be2_ref,             # layer 2: Linear + LayerNorm
    wo_ref, bo_ref,                              # discrim_output head
    loss_ref,     # [1, TB] f32 (lane-dense output row)
):
    cdt = rnn_ref.dtype  # dtype fed to the MXU

    # --- MLPLayer: (Linear -> ReLU -> LayerNorm) x 2, f32 accumulation -----
    # cat([rnn, act], -1) @ w1 == rnn @ w1[:rnn_dim] + act @ w1[rnn_dim:]
    h = (jnp.dot(rnn_ref[...], w1r_ref[...], preferred_element_type=jnp.float32)
         + jnp.dot(act_ref[...], w1a_ref[...], preferred_element_type=jnp.float32)
         + b1_ref[...])
    h = jnp.maximum(h, 0.0)
    h = _layernorm(h, g1_ref[...], be1_ref[...])

    h = jnp.dot(h.astype(cdt), w2_ref[...],
                preferred_element_type=jnp.float32) + b2_ref[...]
    h = jnp.maximum(h, 0.0)
    h = _layernorm(h, g2_ref[...], be2_ref[...])

    # --- discrim_output head ------------------------------------------------
    logits = (jnp.dot(h.astype(cdt), wo_ref[...],
                      preferred_element_type=jnp.float32) + bo_ref[...])

    # --- behav_ids = argmax(label, -1) (first occurrence, like torch) -------
    label = label_ref[...]
    latent = label.shape[-1]
    col = lax.broadcasted_iota(jnp.int32, label.shape, 1)   # [TB, latent]
    lmax = jnp.max(label, axis=-1, keepdims=True)
    cand = jnp.where(label >= lmax, col, latent)            # non-max -> sentinel
    behav_idx = jnp.min(cand, axis=-1, keepdims=True)       # first argmax

    # --- cross_entropy(logits, behav_ids, reduction='none') -----------------
    m = jnp.max(logits, axis=-1, keepdims=True)
    lse = m + jnp.log(jnp.sum(jnp.exp(logits - m), axis=-1, keepdims=True))
    picked = jnp.sum(jnp.where(col == behav_idx, logits, 0.0),
                     axis=-1, keepdims=True)
    loss = (lse - picked) * mask_ref[...]                    # [TB, 1]

    # --- lane-dense writeback: [TB, 1] column -> [1, TB] row -----------------
    # Blockwise 128-wide diagonal extraction against a VMEM-resident identity:
    # per 128-row chunk,  row[0, j] = sum_k eye[k, j] * loss[k]  = loss[j].
    # Linear cost (TB/128 chunks of one broadcast-mul + one sublane reduce)
    # instead of the previous O(TB^2) full-tile mask/sum.
    eye = eye_ref[...]
    tb = loss.shape[0]          # static; always a multiple of 128
    for j in range(tb // _LANE):
        chunk = loss[j * _LANE:(j + 1) * _LANE, :]                    # [128, 1]
        loss_ref[:, j * _LANE:(j + 1) * _LANE] = jnp.sum(
            eye * chunk, axis=0, keepdims=True)                       # [1, 128]

    # TODO(synk): hidden=32 / latent=8 use only 32 of 128 lanes per f32 vreg in
    # this sample-major layout; a fully feature-major (transposed) kernel would
    # use all 128 lanes and need no diagonal writeback at all, but changes the
    # layout substantially — left out to keep the module semantics/readability.


def _round_up(x, m):
    return (x + m - 1) // m * m


def behavior_discriminator_forward(obs, rnn_states, actions, params,
                                   behavior_latent_dim, active_mask=None, *,
                                   block_rows=512,
                                   compute_dtype=jnp.float32):
    """BehaviorDiscriminator.forward: per-sample cross-entropy loss, shape [B]."""
    assert block_rows % _LANE == 0, "block_rows must be a multiple of 128"
    B = actions.shape[0]
    rnn_flat = rnn_states.reshape(B, -1).astype(jnp.float32)
    actions_f = actions.astype(jnp.float32)
    label = obs[..., -behavior_latent_dim:].astype(jnp.float32)
    rnn_dim = rnn_flat.shape[-1]
    act_dim = actions_f.shape[-1]

    if active_mask is None:
        mask = jnp.ones((B, 1), jnp.float32)
    else:
        mask = active_mask.astype(jnp.float32).reshape(B, 1)

    # Row tile: always a multiple of 128 so the (1, TB) loss block is
    # lane-aligned (no masked partial stores) and the in-kernel 128-chunk
    # diagonal writeback divides evenly.
    b128 = _round_up(B, _LANE)
    tb = b128 if b128 <= block_rows else block_rows
    b_pad = _round_up(B, tb)
    grid = b_pad // tb

    def pad_rows(a):
        return a if b_pad == B else jnp.pad(a, ((0, b_pad - B), (0, 0)))

    rnn_p = pad_rows(rnn_flat).astype(compute_dtype)
    act_p = pad_rows(actions_f).astype(compute_dtype)
    label_p = pad_rows(label)            # f32
    mask_p = pad_rows(mask)              # f32; padded rows -> zero loss

    eye = jnp.eye(_LANE, dtype=jnp.float32)   # 64 KiB, VMEM-resident

    w1, b1, g1, be1, w2, b2, g2, be2, wo, bo = params
    # Concat fusion: split w1 so the kernel consumes rnn and actions directly.
    w1r = w1[:rnn_dim].astype(compute_dtype)
    w1a = w1[rnn_dim:].astype(compute_dtype)
    w2c = w2.astype(compute_dtype)
    woc = wo.astype(compute_dtype)

    def row_spec(feat):
        return pl.BlockSpec((tb, feat), lambda i: (i, 0))

    def const_spec(arr):   # full array, fetched once, stays VMEM-resident
        return pl.BlockSpec(arr.shape, lambda i: (0, 0))

    loss2d = pl.pallas_call(
        _behavior_discriminator_kernel,
        out_shape=jax.ShapeDtypeStruct((1, b_pad), jnp.float32),
        grid_spec=pltpu.PrefetchScalarGridSpec(
            num_scalar_prefetch=0,
            grid=(grid,),
            in_specs=[
                row_spec(rnn_dim),               # rnn_flat
                row_spec(act_dim),               # actions
                row_spec(behavior_latent_dim),   # label
                row_spec(1),                     # active mask
                const_spec(eye),
                const_spec(w1r), const_spec(w1a),
                const_spec(b1), const_spec(g1), const_spec(be1),
                const_spec(w2c), const_spec(b2), const_spec(g2), const_spec(be2),
                const_spec(woc), const_spec(bo),
            ],
            out_specs=pl.BlockSpec((1, tb), lambda i: (0, i)),
        ),
        compiler_params=pltpu.CompilerParams(
            dimension_semantics=("parallel",)),
    )(rnn_p, act_p, label_p, mask_p, eye,
      w1r, w1a, b1, g1, be1, w2c, b2, g2, be2, woc, bo)

    return loss2d[0, :B]


def make_params(key, input_size, hidden_sizes, behavior_latent_dim):
    """Deterministic synthetic parameters (scaled normal weights, zero biases)."""
    h1, h2 = hidden_sizes
    ks = jax.random.split(key, 3)

    def lin(k, fan_in, fan_out):
        w = jax.random.normal(k, (fan_in, fan_out), jnp.float32) / jnp.sqrt(fan_in)
        b = jnp.zeros((1, fan_out), jnp.float32)
        return w, b

    w1, b1 = lin(ks[0], input_size, h1)
    w2, b2 = lin(ks[1], h1, h2)
    wo, bo = lin(ks[2], h2, behavior_latent_dim)
    g1, be1 = jnp.ones((1, h1), jnp.float32), jnp.zeros((1, h1), jnp.float32)
    g2, be2 = jnp.ones((1, h2), jnp.float32), jnp.zeros((1, h2), jnp.float32)
    return (w1, b1, g1, be1, w2, b2, g2, be2, wo, bo)


def _reference(obs, rnn_states, actions, params, latent, active_mask=None):
    """Pure-JAX reference for correctness check."""
    w1, b1, g1, be1, w2, b2, g2, be2, wo, bo = params
    B = actions.shape[0]
    label = obs[..., -latent:]
    x = jnp.concatenate([rnn_states.reshape(B, -1), actions], axis=-1)
    h = jnp.maximum(x @ w1 + b1, 0.0)
    h = (h - h.mean(-1, keepdims=True)) / jnp.sqrt(h.var(-1, keepdims=True) + LN_EPS) * g1 + be1
    h = jnp.maximum(h @ w2 + b2, 0.0)
    h = (h - h.mean(-1, keepdims=True)) / jnp.sqrt(h.var(-1, keepdims=True) + LN_EPS) * g2 + be2
    logits = h @ wo + bo
    ids = jnp.argmax(label, -1)
    lse = jax.nn.logsumexp(logits, axis=-1)
    picked = jnp.take_along_axis(logits, ids[:, None], axis=-1)[:, 0]
    loss = lse - picked
    if active_mask is not None:
        loss = loss * active_mask.reshape(B)
    return loss


if __name__ == "__main__":
    # Small shapes implied by the module:
    B = 8                       # batch
    rec_n, rnn_hidden = 1, 16   # rnn_states: (B, rec_n, rnn_hidden)
    action_dim = 4
    behavior_latent_dim = 8
    obs_dim = 12 + behavior_latent_dim   # last `latent` dims are the label
    hidden_sizes = (32, 32)
    input_size = rec_n * rnn_hidden + action_dim

    key = jax.random.PRNGKey(0)
    k_obs, k_rnn, k_act, k_mask, k_par = jax.random.split(key, 5)

    obs = jax.random.normal(k_obs, (B, obs_dim), jnp.float32)
    rnn_states = jax.random.normal(k_rnn, (B, rec_n, rnn_hidden), jnp.float32)
    actions = jax.random.normal(k_act, (B, action_dim), jnp.float32)
    active_mask = (jax.random.uniform(k_mask, (B, 1)) > 0.3).astype(jnp.float32)

    params = make_params(k_par, input_size, hidden_sizes, behavior_latent_dim)
    ref = _reference(obs, rnn_states, actions, params, behavior_latent_dim, active_mask)

    # 1) f32 path, single (lane-padded) tile.
    loss_f32 = behavior_discriminator_forward(
        obs, rnn_states, actions, params, behavior_latent_dim, active_mask)
    loss_f32 = jax.block_until_ready(loss_f32)
    assert loss_f32.shape == (B,)
    assert jnp.allclose(loss_f32, ref, atol=5e-4, rtol=5e-4), (loss_f32, ref)

    # 2) bf16 MXU operands (v6e/v7x recommendation), f32 elementwise/accum.
    loss_bf16 = behavior_discriminator_forward(
        obs, rnn_states, actions, params, behavior_latent_dim, active_mask,
        compute_dtype=jnp.bfloat16)
    loss_bf16 = jax.block_until_ready(loss_bf16)
    assert jnp.allclose(loss_bf16, ref, atol=2e-1, rtol=1e-1), (loss_bf16, ref)

    # 3) multi-tile grid + ragged tail (B not a multiple of the row tile).
    B2 = 300
    k2 = jax.random.split(key, 4)
    obs2 = jax.random.normal(k2[0], (B2, obs_dim), jnp.float32)
    rnn2 = jax.random.normal(k2[1], (B2, rec_n, rnn_hidden), jnp.float32)
    act2 = jax.random.normal(k2[2], (B2, action_dim), jnp.float32)
    loss2 = behavior_discriminator_forward(
        obs2, rnn2, act2, params, behavior_latent_dim, None, block_rows=128)
    loss2 = jax.block_until_ready(loss2)
    ref2 = _reference(obs2, rnn2, act2, params, behavior_latent_dim, None)
    assert loss2.shape == (B2,)
    assert jnp.allclose(loss2, ref2, atol=1e-3, rtol=1e-3), (loss2, ref2)

    print("KERNEL_OK")
</pallas_src>

<mosaic_0001>
module attributes {stable_mosaic.version = 11 : i64} {
  func.func @_behavior_discriminator_kernel(%arg0: i32, %arg1: memref<128x16xf32, #tpu.memory_space<vmem>>, %arg2: memref<128x4xf32, #tpu.memory_space<vmem>>, %arg3: memref<128x8xf32, #tpu.memory_space<vmem>>, %arg4: memref<128x1xf32, #tpu.memory_space<vmem>>, %arg5: memref<128x128xf32, #tpu.memory_space<vmem>>, %arg6: memref<16x32xf32, #tpu.memory_space<vmem>>, %arg7: memref<4x32xf32, #tpu.memory_space<vmem>>, %arg8: memref<1x32xf32, #tpu.memory_space<vmem>>, %arg9: memref<1x32xf32, #tpu.memory_space<vmem>>, %arg10: memref<1x32xf32, #tpu.memory_space<vmem>>, %arg11: memref<32x32xf32, #tpu.memory_space<vmem>>, %arg12: memref<1x32xf32, #tpu.memory_space<vmem>>, %arg13: memref<1x32xf32, #tpu.memory_space<vmem>>, %arg14: memref<1x32xf32, #tpu.memory_space<vmem>>, %arg15: memref<32x8xf32, #tpu.memory_space<vmem>>, %arg16: memref<1x8xf32, #tpu.memory_space<vmem>>, %arg17: memref<1x128xf32, #tpu.memory_space<vmem>>) attributes {dimension_semantics = [#tpu.dimension_semantics<parallel>], iteration_bounds = array<i64: 1>, scalar_prefetch = 0 : i64, scratch_operands = 0 : i64, tpu.core_type = #tpu.core_type<tc>, window_params = [{transform_indices = @transform_0, window_bounds = array<i64: 128, 16>}, {transform_indices = @transform_1, window_bounds = array<i64: 128, 4>}, {transform_indices = @transform_2, window_bounds = array<i64: 128, 8>}, {transform_indices = @transform_3, window_bounds = array<i64: 128, 1>}, {pipeline_mode = #tpu.pipeline_mode<synchronous>, transform_indices = @transform_4, window_bounds = array<i64: 128, 128>}, {pipeline_mode = #tpu.pipeline_mode<synchronous>, transform_indices = @transform_5, window_bounds = array<i64: 16, 32>}, {pipeline_mode = #tpu.pipeline_mode<synchronous>, transform_indices = @transform_6, window_bounds = array<i64: 4, 32>}, {pipeline_mode = #tpu.pipeline_mode<synchronous>, transform_indices = @transform_7, window_bounds = array<i64: 1, 32>}, {pipeline_mode = #tpu.pipeline_mode<synchronous>, transform_indices = @transform_8, window_bounds = array<i64: 1, 32>}, {pipeline_mode = #tpu.pipeline_mode<synchronous>, transform_indices = @transform_9, window_bounds = array<i64: 1, 32>}, {pipeline_mode = #tpu.pipeline_mode<synchronous>, transform_indices = @transform_10, window_bounds = array<i64: 32, 32>}, {pipeline_mode = #tpu.pipeline_mode<synchronous>, transform_indices = @transform_11, window_bounds = array<i64: 1, 32>}, {pipeline_mode = #tpu.pipeline_mode<synchronous>, transform_indices = @transform_12, window_bounds = array<i64: 1, 32>}, {pipeline_mode = #tpu.pipeline_mode<synchronous>, transform_indices = @transform_13, window_bounds = array<i64: 1, 32>}, {pipeline_mode = #tpu.pipeline_mode<synchronous>, transform_indices = @transform_14, window_bounds = array<i64: 32, 8>}, {pipeline_mode = #tpu.pipeline_mode<synchronous>, transform_indices = @transform_15, window_bounds = array<i64: 1, 8>}, {transform_indices = @transform_16, window_bounds = array<i64: 1, 128>}]} {
    %c0 = arith.constant 0 : index
    %c0_0 = arith.constant 0 : index
    %0 = vector.load %arg1[%c0, %c0_0] : memref<128x16xf32, #tpu.memory_space<vmem>>, vector<128x16xf32>
    %c0_1 = arith.constant 0 : index
    %c0_2 = arith.constant 0 : index
    %1 = vector.load %arg6[%c0_1, %c0_2] : memref<16x32xf32, #tpu.memory_space<vmem>>, vector<16x32xf32>
    %cst = arith.constant dense<0.000000e+00> : vector<128x32xf32>
    %2 = tpu.matmul %0, %1, %cst {dimension_numbers = #tpu.dot_dimension_numbers<[1], [0], [0], [1], [0, 0, 1, 1], [], []>} : vector<128x16xf32>, vector<16x32xf32>, vector<128x32xf32> -> vector<128x32xf32>
    %c0_3 = arith.constant 0 : index
    %c0_4 = arith.constant 0 : index
    %3 = vector.load %arg2[%c0_3, %c0_4] : memref<128x4xf32, #tpu.memory_space<vmem>>, vector<128x4xf32>
    %c0_5 = arith.constant 0 : index
    %c0_6 = arith.constant 0 : index
    %4 = vector.load %arg7[%c0_5, %c0_6] : memref<4x32xf32, #tpu.memory_space<vmem>>, vector<4x32xf32>
    %cst_7 = arith.constant dense<0.000000e+00> : vector<128x32xf32>
    %5 = tpu.matmul %3, %4, %cst_7 {dimension_numbers = #tpu.dot_dimension_numbers<[1], [0], [0], [1], [0, 0, 1, 1], [], []>} : vector<128x4xf32>, vector<4x32xf32>, vector<128x32xf32> -> vector<128x32xf32>
    %6 = arith.addf %2, %5 : vector<128x32xf32>
    %c0_8 = arith.constant 0 : index
    %c0_9 = arith.constant 0 : index
    %7 = vector.load %arg8[%c0_8, %c0_9] : memref<1x32xf32, #tpu.memory_space<vmem>>, vector<1x32xf32>
    %8 = vector.broadcast %7 : vector<1x32xf32> to vector<128x32xf32>
    %9 = arith.addf %6, %8 : vector<128x32xf32>
    %cst_10 = arith.constant 0.000000e+00 : f32
    %10 = vector.broadcast %cst_10 : f32 to vector<128x32xf32>
    %11 = arith.maximumf %9, %10 : vector<128x32xf32>
    %c0_11 = arith.constant 0 : index
    %c0_12 = arith.constant 0 : index
    %12 = vector.load %arg9[%c0_11, %c0_12] : memref<1x32xf32, #tpu.memory_space<vmem>>, vector<1x32xf32>
    %c0_13 = arith.constant 0 : index
    %c0_14 = arith.constant 0 : index
    %13 = vector.load %arg10[%c0_13, %c0_14] : memref<1x32xf32, #tpu.memory_space<vmem>>, vector<1x32xf32>
    %cst_15 = arith.constant dense<0.000000e+00> : vector<128xf32>
    %14 = vector.multi_reduction <add>, %11, %cst_15 [1] : vector<128x32xf32> to vector<128xf32>
    %15 = vector.shape_cast %14 : vector<128xf32> to vector<128x1xf32>
    %cst_16 = arith.constant 3.200000e+01 : f32
    %16 = vector.broadcast %cst_16 : f32 to vector<128x1xf32>
    %17 = arith.divf %15, %16 : vector<128x1xf32>
    %18 = vector.broadcast %17 : vector<128x1xf32> to vector<128x32xf32>
    %19 = arith.subf %11, %18 : vector<128x32xf32>
    %20 = arith.mulf %19, %19 : vector<128x32xf32>
    %cst_17 = arith.constant dense<0.000000e+00> : vector<128xf32>
    %21 = vector.multi_reduction <add>, %20, %cst_17 [1] : vector<128x32xf32> to vector<128xf32>
    %22 = vector.shape_cast %21 : vector<128xf32> to vector<128x1xf32>
    %cst_18 = arith.constant 3.200000e+01 : f32
    %23 = vector.broadcast %cst_18 : f32 to vector<128x1xf32>
    %24 = arith.divf %22, %23 : vector<128x1xf32>
    %25 = vector.broadcast %17 : vector<128x1xf32> to vector<128x32xf32>
    %26 = arith.subf %11, %25 : vector<128x32xf32>
    %cst_19 = arith.constant 9.99999974E-6 : f32
    %27 = vector.broadcast %cst_19 : f32 to vector<128x1xf32>
    %28 = arith.addf %24, %27 : vector<128x1xf32>
    %29 = math.rsqrt %28 : vector<128x1xf32>
    %30 = vector.broadcast %29 : vector<128x1xf32> to vector<128x32xf32>
    %31 = arith.mulf %26, %30 : vector<128x32xf32>
    %32 = vector.broadcast %12 : vector<1x32xf32> to vector<128x32xf32>
    %33 = arith.mulf %31, %32 : vector<128x32xf32>
    %34 = vector.broadcast %13 : vector<1x32xf32> to vector<128x32xf32>
    %35 = arith.addf %33, %34 : vector<128x32xf32>
    %c0_20 = arith.constant 0 : index
    %c0_21 = arith.constant 0 : index
    %36 = vector.load %arg11[%c0_20, %c0_21] : memref<32x32xf32, #tpu.memory_space<vmem>>, vector<32x32xf32>
    %cst_22 = arith.constant dense<0.000000e+00> : vector<128x32xf32>
    %37 = tpu.matmul %35, %36, %cst_22 {dimension_numbers = #tpu.dot_dimension_numbers<[1], [0], [0], [1], [0, 0, 1, 1], [], []>} : vector<128x32xf32>, vector<32x32xf32>, vector<128x32xf32> -> vector<128x32xf32>
    %c0_23 = arith.constant 0 : index
    %c0_24 = arith.constant 0 : index
    %38 = vector.load %arg12[%c0_23, %c0_24] : memref<1x32xf32, #tpu.memory_space<vmem>>, vector<1x32xf32>
    %39 = vector.broadcast %38 : vector<1x32xf32> to vector<128x32xf32>
    %40 = arith.addf %37, %39 : vector<128x32xf32>
    %cst_25 = arith.constant 0.000000e+00 : f32
    %41 = vector.broadcast %cst_25 : f32 to vector<128x32xf32>
    %42 = arith.maximumf %40, %41 : vector<128x32xf32>
    %c0_26 = arith.constant 0 : index
    %c0_27 = arith.constant 0 : index
    %43 = vector.load %arg13[%c0_26, %c0_27] : memref<1x32xf32, #tpu.memory_space<vmem>>, vector<1x32xf32>
    %c0_28 = arith.constant 0 : index
    %c0_29 = arith.constant 0 : index
    %44 = vector.load %arg14[%c0_28, %c0_29] : memref<1x32xf32, #tpu.memory_space<vmem>>, vector<1x32xf32>
    %cst_30 = arith.constant dense<0.000000e+00> : vector<128xf32>
    %45 = vector.multi_reduction <add>, %42, %cst_30 [1] : vector<128x32xf32> to vector<128xf32>
    %46 = vector.shape_cast %45 : vector<128xf32> to vector<128x1xf32>
    %cst_31 = arith.constant 3.200000e+01 : f32
    %47 = vector.broadcast %cst_31 : f32 to vector<128x1xf32>
    %48 = arith.divf %46, %47 : vector<128x1xf32>
    %49 = vector.broadcast %48 : vector<128x1xf32> to vector<128x32xf32>
    %50 = arith.subf %42, %49 : vector<128x32xf32>
    %51 = arith.mulf %50, %50 : vector<128x32xf32>
    %cst_32 = arith.constant dense<0.000000e+00> : vector<128xf32>
    %52 = vector.multi_reduction <add>, %51, %cst_32 [1] : vector<128x32xf32> to vector<128xf32>
    %53 = vector.shape_cast %52 : vector<128xf32> to vector<128x1xf32>
    %cst_33 = arith.constant 3.200000e+01 : f32
    %54 = vector.broadcast %cst_33 : f32 to vector<128x1xf32>
    %55 = arith.divf %53, %54 : vector<128x1xf32>
    %56 = vector.broadcast %48 : vector<128x1xf32> to vector<128x32xf32>
    %57 = arith.subf %42, %56 : vector<128x32xf32>
    %cst_34 = arith.constant 9.99999974E-6 : f32
    %58 = vector.broadcast %cst_34 : f32 to vector<128x1xf32>
    %59 = arith.addf %55, %58 : vector<128x1xf32>
    %60 = math.rsqrt %59 : vector<128x1xf32>
    %61 = vector.broadcast %60 : vector<128x1xf32> to vector<128x32xf32>
    %62 = arith.mulf %57, %61 : vector<128x32xf32>
    %63 = vector.broadcast %43 : vector<1x32xf32> to vector<128x32xf32>
    %64 = arith.mulf %62, %63 : vector<128x32xf32>
    %65 = vector.broadcast %44 : vector<1x32xf32> to vector<128x32xf32>
    %66 = arith.addf %64, %65 : vector<128x32xf32>
    %c0_35 = arith.constant 0 : index
    %c0_36 = arith.constant 0 : index
    %67 = vector.load %arg15[%c0_35, %c0_36] : memref<32x8xf32, #tpu.memory_space<vmem>>, vector<32x8xf32>
    %cst_37 = arith.constant dense<0.000000e+00> : vector<128x8xf32>
    %68 = tpu.matmul %66, %67, %cst_37 {dimension_numbers = #tpu.dot_dimension_numbers<[1], [0], [0], [1], [0, 0, 1, 1], [], []>} : vector<128x32xf32>, vector<32x8xf32>, vector<128x8xf32> -> vector<128x8xf32>
    %c0_38 = arith.constant 0 : index
    %c0_39 = arith.constant 0 : index
    %69 = vector.load %arg16[%c0_38, %c0_39] : memref<1x8xf32, #tpu.memory_space<vmem>>, vector<1x8xf32>
    %70 = vector.broadcast %69 : vector<1x8xf32> to vector<128x8xf32>
    %71 = arith.addf %68, %70 : vector<128x8xf32>
    %c0_40 = arith.constant 0 : index
    %c0_41 = arith.constant 0 : index
    %72 = vector.load %arg3[%c0_40, %c0_41] : memref<128x8xf32, #tpu.memory_space<vmem>>, vector<128x8xf32>
    %73 = tpu.iota {dimensions = array<i32: 1>} : vector<128x8xi32>
    %cst_42 = arith.constant dense<0xFF800000> : vector<128xf32>
    %74 = vector.multi_reduction <maximumf>, %72, %cst_42 [1] : vector<128x8xf32> to vector<128xf32>
    %75 = vector.shape_cast %74 : vector<128xf32> to vector<128x1xf32>
    %76 = vector.broadcast %75 : vector<128x1xf32> to vector<128x8xf32>
    %77 = arith.cmpf oge, %72, %76 : vector<128x8xf32>
    %c8_i32 = arith.constant 8 : i32
    %78 = vector.broadcast %c8_i32 : i32 to vector<128x8xi32>
    %79 = arith.select %77, %73, %78 : vector<128x8xi1>, vector<128x8xi32>
    %cst_43 = arith.constant dense<2147483647> : vector<128xi32>
    %80 = vector.multi_reduction <minsi>, %79, %cst_43 [1] : vector<128x8xi32> to vector<128xi32>
    %81 = vector.shape_cast %80 : vector<128xi32> to vector<128x1xi32>
    %cst_44 = arith.constant dense<0xFF800000> : vector<128xf32>
    %82 = vector.multi_reduction <maximumf>, %71, %cst_44 [1] : vector<128x8xf32> to vector<128xf32>
    %83 = vector.shape_cast %82 : vector<128xf32> to vector<128x1xf32>
    %84 = vector.broadcast %83 : vector<128x1xf32> to vector<128x8xf32>
    %85 = arith.subf %71, %84 : vector<128x8xf32>
    %86 = math.exp %85 : vector<128x8xf32>
    %cst_45 = arith.constant dense<0.000000e+00> : vector<128xf32>
    %87 = vector.multi_reduction <add>, %86, %cst_45 [1] : vector<128x8xf32> to vector<128xf32>
    %88 = vector.shape_cast %87 : vector<128xf32> to vector<128x1xf32>
    %89 = math.log %88 : vector<128x1xf32>
    %90 = arith.addf %83, %89 : vector<128x1xf32>
    %91 = vector.broadcast %81 : vector<128x1xi32> to vector<128x8xi32>
    %92 = arith.cmpi eq, %73, %91 : vector<128x8xi32>
    %cst_46 = arith.constant 0.000000e+00 : f32
    %93 = vector.broadcast %cst_46 : f32 to vector<128x8xf32>
    %94 = arith.select %92, %71, %93 : vector<128x8xi1>, vector<128x8xf32>
    %cst_47 = arith.constant dense<0.000000e+00> : vector<128xf32>
    %95 = vector.multi_reduction <add>, %94, %cst_47 [1] : vector<128x8xf32> to vector<128xf32>
    %96 = vector.shape_cast %95 : vector<128xf32> to vector<128x1xf32>
    %97 = arith.subf %90, %96 : vector<128x1xf32>
    %c0_48 = arith.constant 0 : index
    %c0_49 = arith.constant 0 : index
    %98 = vector.load %arg4[%c0_48, %c0_49] : memref<128x1xf32, #tpu.memory_space<vmem>>, vector<128x1xf32>
    %99 = arith.mulf %97, %98 : vector<128x1xf32>
    %c0_50 = arith.constant 0 : index
    %c0_51 = arith.constant 0 : index
    %100 = vector.load %arg5[%c0_50, %c0_51] : memref<128x128xf32, #tpu.memory_space<vmem>>, vector<128x128xf32>
    %101 = vector.broadcast %99 : vector<128x1xf32> to vector<128x128xf32>
    %102 = arith.mulf %100, %101 : vector<128x128xf32>
    %cst_52 = arith.constant dense<0.000000e+00> : vector<128xf32>
    %103 = vector.multi_reduction <add>, %102, %cst_52 [0] : vector<128x128xf32> to vector<128xf32>
    %104 = vector.shape_cast %103 : vector<128xf32> to vector<1x128xf32>
    %c0_53 = arith.constant 0 : index
    %c0_54 = arith.constant 0 : index
    %105 = vector.load %arg17[%c0_53, %c0_54] : memref<1x128xf32, #tpu.memory_space<vmem>>, vector<1x128xf32>
    tpu.vector_store %arg17[%c0_53, %c0_54], %104 {strides = array<i32>} : memref<1x128xf32, #tpu.memory_space<vmem>>, vector<1x128xf32>,
    return
  }
  func.func @transform_0(%arg0: i32) -> (i32, i32) {
    %c0_i32 = arith.constant 0 : i32
    %c0_i32_0 = arith.constant 0 : i32
    return %arg0, %c0_i32 : i32, i32
  }
  func.func @transform_1(%arg0: i32) -> (i32, i32) {
    %c0_i32 = arith.constant 0 : i32
    %c0_i32_0 = arith.constant 0 : i32
    return %arg0, %c0_i32 : i32, i32
  }
  func.func @transform_2(%arg0: i32) -> (i32, i32) {
    %c0_i32 = arith.constant 0 : i32
    %c0_i32_0 = arith.constant 0 : i32
    return %arg0, %c0_i32 : i32, i32
  }
  func.func @transform_3(%arg0: i32) -> (i32, i32) {
    %c0_i32 = arith.constant 0 : i32
    %c0_i32_0 = arith.constant 0 : i32
    return %arg0, %c0_i32 : i32, i32
  }
  func.func @transform_4(%arg0: i32) -> (i32, i32) {
    %c0_i32 = arith.constant 0 : i32
    %c0_i32_0 = arith.constant 0 : i32
    %c0_i32_1 = arith.constant 0 : i32
    return %c0_i32, %c0_i32_0 : i32, i32
  }
  func.func @transform_5(%arg0: i32) -> (i32, i32) {
    %c0_i32 = arith.constant 0 : i32
    %c0_i32_0 = arith.constant 0 : i32
    %c0_i32_1 = arith.constant 0 : i32
    return %c0_i32, %c0_i32_0 : i32, i32
  }
  func.func @transform_6(%arg0: i32) -> (i32, i32) {
    %c0_i32 = arith.constant 0 : i32
    %c0_i32_0 = arith.constant 0 : i32
    %c0_i32_1 = arith.constant 0 : i32
    return %c0_i32, %c0_i32_0 : i32, i32
  }
  func.func @transform_7(%arg0: i32) -> (i32, i32) {
    %c0_i32 = arith.constant 0 : i32
    %c0_i32_0 = arith.constant 0 : i32
    %c0_i32_1 = arith.constant 0 : i32
    return %c0_i32, %c0_i32_0 : i32, i32
  }
  func.func @transform_8(%arg0: i32) -> (i32, i32) {
    %c0_i32 = arith.constant 0 : i32
    %c0_i32_0 = arith.constant 0 : i32
    %c0_i32_1 = arith.constant 0 : i32
    return %c0_i32, %c0_i32_0 : i32, i32
  }
  func.func @transform_9(%arg0: i32) -> (i32, i32) {
    %c0_i32 = arith.constant 0 : i32
    %c0_i32_0 = arith.constant 0 : i32
    %c0_i32_1 = arith.constant 0 : i32
    return %c0_i32, %c0_i32_0 : i32, i32
  }
  func.func @transform_10(%arg0: i32) -> (i32, i32) {
    %c0_i32 = arith.constant 0 : i32
    %c0_i32_0 = arith.constant 0 : i32
    %c0_i32_1 = arith.constant 0 : i32
    return %c0_i32, %c0_i32_0 : i32, i32
  }
  func.func @transform_11(%arg0: i32) -> (i32, i32) {
    %c0_i32 = arith.constant 0 : i32
    %c0_i32_0 = arith.constant 0 : i32
    %c0_i32_1 = arith.constant 0 : i32
    return %c0_i32, %c0_i32_0 : i32, i32
  }
  func.func @transform_12(%arg0: i32) -> (i32, i32) {
    %c0_i32 = arith.constant 0 : i32
    %c0_i32_0 = arith.constant 0 : i32
    %c0_i32_1 = arith.constant 0 : i32
    return %c0_i32, %c0_i32_0 : i32, i32
  }
  func.func @transform_13(%arg0: i32) -> (i32, i32) {
    %c0_i32 = arith.constant 0 : i32
    %c0_i32_0 = arith.constant 0 : i32
    %c0_i32_1 = arith.constant 0 : i32
    return %c0_i32, %c0_i32_0 : i32, i32
  }
  func.func @transform_14(%arg0: i32) -> (i32, i32) {
    %c0_i32 = arith.constant 0 : i32
    %c0_i32_0 = arith.constant 0 : i32
    %c0_i32_1 = arith.constant 0 : i32
    return %c0_i32, %c0_i32_0 : i32, i32
  }
  func.func @transform_15(%arg0: i32) -> (i32, i32) {
    %c0_i32 = arith.constant 0 : i32
    %c0_i32_0 = arith.constant 0 : i32
    %c0_i32_1 = arith.constant 0 : i32
    return %c0_i32, %c0_i32_0 : i32, i32
  }
  func.func @transform_16(%arg0: i32) -> (i32, i32) {
    %c0_i32 = arith.constant 0 : i32
    %c0_i32_0 = arith.constant 0 : i32
    return %c0_i32, %arg0 : i32, i32
  }
}

</mosaic_0001>

<bundles_post_ra>
// kernel: tpu_custom_call.1
= control target key start
LH: loop header
LB: loop body
LE: loop exit
PB: predicated region body
PF: predicated region fallthrough
CT: control target
= control target key end

     0   :  { %s4281_s0 = inlined_call_operand.vmem [shape: f32[128,16], index: 0, kind: input, shape index: {}]   ;;  %s4282_s1 = inlined_call_operand.vmem [shape: f32[128,4], index: 1, kind: input, shape index: {}]   ;;  %s4283_s2 = inlined_call_operand.vmem [shape: f32[128,8], index: 2, kind: input, shape index: {}]   ;;  %s4284_s3 = inlined_call_operand.vmem [shape: f32[128,1], index: 3, kind: input, shape index: {}]   ;;  %s4285_s4 = inlined_call_operand.vmem [shape: f32[128,128], index: 4, kind: input, shape index: {}]   ;;  %s4286_s5 = inlined_call_operand.vmem [shape: f32[16,32], index: 5, kind: input, shape index: {}]   ;;  %s4287_s6 = inlined_call_operand.vmem [shape: f32[4,32], index: 6, kind: input, shape index: {}]   ;;  %s4288_s7 = inlined_call_operand.vmem [shape: f32[1,32], index: 7, kind: input, shape index: {}]   ;;  %s4289_s8 = inlined_call_operand.vmem [shape: f32[1,32], index: 8, kind: input, shape index: {}]   ;;  %s4290_s9 = inlined_call_operand.vmem [shape: f32[1,32], index: 9, kind: input, shape index: {}]   ;;  %s4291_s10 = inlined_call_operand.vmem [shape: f32[32,32], index: 10, kind: input, shape index: {}]   ;;  %s4292_s11 = inlined_call_operand.vmem [shape: f32[1,32], index: 11, kind: input, shape index: {}]   ;;  %s4293_s12 = inlined_call_operand.vmem [shape: f32[1,32], index: 12, kind: input, shape index: {}]   ;;  %s4294_s13 = inlined_call_operand.vmem [shape: f32[1,32], index: 13, kind: input, shape index: {}]   ;;  %s4295_s14 = inlined_call_operand.vmem [shape: f32[32,8], index: 14, kind: input, shape index: {}]   ;;  %s4296_s15 = inlined_call_operand.vmem [shape: f32[1,8], index: 15, kind: input, shape index: {}]   ;;  %s4297_s16 = inlined_call_operand.hbm [shape: f32[1,128], index: 16, kind: output, shape index: {}]  }
   0x1   :  { %4299 = sst [smem:[#allocation5_spill]] %s4281_s0 }
   0x2   :  { %v88_v0 = vld [vmem:[%s4287_s6] sm:$0xf]  ;;  %vm138_vm0 = vcmask 1043456   ;;  %vm89_vm1 = vcmask 31744   ;;  %v73_v2 = vld [vmem:[%s4282_s1 + $0x8] sm:$0xff]  ;;  %v74_v5 = vld [vmem:[%s4282_s1 + $0x10] sm:$0xff] }
   0x3   :  { %v72_v1 = vld [vmem:[%s4282_s1] sm:$0xff]  ;;  %2408 = vmatprep.subr.msk.mxu0 %vm138_vm0, %v88_v0  ;;  %v71_v4 = vld [vmem:[%s4286_s5 + $0x8] sm:$0xff]  ;;  %v75_v7 = vld [vmem:[%s4282_s1 + $0x18] sm:$0xff] }
   0x4   :  { %2410 = vmatprep.mubr.msk.f32.mxu0 %vm89_vm1, %v72_v1  ;;  %v70_v3 = vld [vmem:[%s4286_s5] sm:$0xff]  ;;  %2409 = vmatpush3.msk.msra.mxu0 %vm138_vm0, %v88_v0  ;;  %v77_v9 = vld [vmem:[%s4282_s1 + $0x28] sm:$0xff]  ;;  %v78_v10 = vld [vmem:[%s4282_s1 + $0x30] sm:$0xff] }
   0x5   :  { %v2526_v6 = vpack.c.bf16 %v71_v4, %v70_v3  ;;  %2411 = vmatmul.mubr.msk.f32.vlgmr.msra.gmra.mrb[0].mxu0 %vm89_vm1, %v73_v2  ;;  %v76_v8 = vld [vmem:[%s4282_s1 + $0x20] sm:$0xff] }
   0x6   :  { %2413 = vmatprep.mubr.msk.f32.mxu0 %vm89_vm1, %v74_v5 }
   0x7   :  { %2527 = vmatprep.subr.bf16.mxu0 %v2526_v6 }
   0x8   :  { %2529 = vmatpush3.bf16.msra.mxu0 %v2526_v6 }
   0x9   :  { %2414 = vmatmul.mubr.msk.f32.gmra.mrb[2].mxu0 %vm89_vm1, %v75_v7 }
   0xa   :  { %2416 = vmatprep.mubr.msk.f32.mxu0 %vm89_vm1, %v76_v8 }
   0xd   :  { %2417 = vmatmul.mubr.msk.f32.gmra.mrb[4].mxu0 %vm89_vm1, %v77_v9 }
   0xe   :  { %21 = vsyncpa [#allocation3], 0  ;;  %2419 = vmatprep.mubr.msk.f32.mxu0 %vm89_vm1, %v78_v10  ;;  %v79_v11 = vld [vmem:[%s4282_s1 + $0x38] sm:$0xff]  ;;  %v80_v12 = vld [vmem:[%s4282_s1 + $0x40] sm:$0xff]  ;;  %s4300_s27 = sld [smem:[#allocation5_spill]]  ;;  %vm287_vm2 = vcmask 130048  }
   0xf   :  { %v81_v13 = vld [vmem:[%s4282_s1 + $0x48] sm:$0xff]  ;;  %v82_v14 = vld [vmem:[%s4282_s1 + $0x50] sm:$0xff]  ;;  %v83_v15 = vld [vmem:[%s4282_s1 + $0x58] sm:$0xff]  ;;  %vm522_vm3 = vcmask 261120   ;;  %vm1472_vm4 = vcmask 64512   ;;  %s2719_s18 = smov [#allocation2]  }
  0x10   :  { %v84_v16 = vld [vmem:[%s4282_s1 + $0x60] sm:$0xff]  ;;  %v85_v17 = vld [vmem:[%s4282_s1 + $0x68] sm:$0xff]  ;;  %v86_v18 = vld [vmem:[%s4282_s1 + $0x70] sm:$0xff]  ;;  %s2253_s19 = sshll.u32 %s2719_s18, 4  ;;  %s2254_s19 = int_to_ptr.vmem [resolvable:$true] %s2253_s19 }
  0x11   :  { %2420 = vmatmul.mubr.msk.f32.gmra.mrb[6].mxu0 %vm89_vm1, %v79_v11  ;;  %v87_v19 = vld [vmem:[%s4282_s1 + $0x78] sm:$0xff]  ;;  %v2945_v36 = vld [vmem:[%s4288_s7] ss:$0 sm:$0xff]  ;;  %s2694_s20 = scalar_lea.vmem %s2254_s19, 16  ;;  %p2699_p1 = scmp.lt.s32.totalorder %s2254_s19, %s2254_s19 }
  0x12   :  { %2422 = vmatprep.mubr.msk.f32.mxu0 %vm89_vm1, %v80_v12  ;;  %p2695_p0 = scmp.ne.s32.totalorder %s2254_s19, %s2694_s20 }
  0x14   :  { %v54_v20 = vld [vmem:[%s4300_s27] sm:$0xff]  ;;  %v55_v21 = vld [vmem:[%s4300_s27 + $0x8] sm:$0xff]  ;;  %v56_v22 = vld [vmem:[%s4300_s27 + $0x10] sm:$0xff] }
  0x15   :  { %2423 = vmatmul.mubr.msk.f32.gmra.mrb[8].mxu0 %vm89_vm1, %v81_v13  ;;  %v57_v23 = vld [vmem:[%s4300_s27 + $0x18] sm:$0xff]  ;;  %v58_v24 = vld [vmem:[%s4300_s27 + $0x20] sm:$0xff]  ;;  %v59_v25 = vld [vmem:[%s4300_s27 + $0x28] sm:$0xff] }
  0x16   :  { %2425 = vmatprep.mubr.msk.f32.mxu0 %vm89_vm1, %v82_v14  ;;  %v60_v26 = vld [vmem:[%s4300_s27 + $0x30] sm:$0xff]  ;;  %v61_v27 = vld [vmem:[%s4300_s27 + $0x38] sm:$0xff]  ;;  %v62_v28 = vld [vmem:[%s4300_s27 + $0x40] sm:$0xff] }
  0x17   :  { %v63_v29 = vld [vmem:[%s4300_s27 + $0x48] sm:$0xff]  ;;  %v64_v30 = vld [vmem:[%s4300_s27 + $0x50] sm:$0xff]  ;;  %v65_v31 = vld [vmem:[%s4300_s27 + $0x58] sm:$0xff] }
  0x18   :  { %v66_v32 = vld [vmem:[%s4300_s27 + $0x60] sm:$0xff]  ;;  %v67_v33 = vld [vmem:[%s4300_s27 + $0x68] sm:$0xff]  ;;  %v68_v34 = vld [vmem:[%s4300_s27 + $0x70] sm:$0xff] }
  0x19   :  { %2426 = vmatmul.mubr.msk.f32.gmra.mrb[10].mxu0 %vm89_vm1, %v83_v15  ;;  %v69_v35 = vld [vmem:[%s4300_s27 + $0x78] sm:$0xff] }
  0x1a   :  { %2428 = vmatprep.mubr.msk.f32.mxu0 %vm89_vm1, %v84_v16 }
  0x1d   :  { %2429 = vmatmul.mubr.msk.f32.gmra.mrb[12].mxu0 %vm89_vm1, %v85_v17 }
  0x1e   :  { %2431 = vmatprep.mubr.msk.f32.mxu0 %vm89_vm1, %v86_v18 }
  0x21   :  { %2432 = vmatmul.mubr.msk.f32.gmra.mrb[14].mxu0 %vm89_vm1, %v87_v19 }
  0x22   :  { %2438 = vmatprep.mubr.msk.f32.mxu0 %vm287_vm2, %v54_v20 }
  0x25   :  { %2439 = vmatmul.mubr.msk.f32.vlgmr.msra.gmra.mrb[0].mxu0 %vm287_vm2, %v55_v21 }
  0x26   :  { %2441 = vmatprep.mubr.msk.f32.mxu0 %vm287_vm2, %v56_v22 }
  0x29   :  { %2442 = vmatmul.mubr.msk.f32.gmra.mrb[2].mxu0 %vm287_vm2, %v57_v23 }
  0x2a   :  { %2444 = vmatprep.mubr.msk.f32.mxu0 %vm287_vm2, %v58_v24 }
  0x2d   :  { %2445 = vmatmul.mubr.msk.f32.gmra.mrb[4].mxu0 %vm287_vm2, %v59_v25 }
  0x2e   :  { %2447 = vmatprep.mubr.msk.f32.mxu0 %vm287_vm2, %v60_v26 }
  0x31   :  { %2448 = vmatmul.mubr.msk.f32.gmra.mrb[6].mxu0 %vm287_vm2, %v61_v27 }
  0x32   :  { %2450 = vmatprep.mubr.msk.f32.mxu0 %vm287_vm2, %v62_v28 }
  0x35   :  { %2451 = vmatmul.mubr.msk.f32.gmra.mrb[8].mxu0 %vm287_vm2, %v63_v29 }
  0x36   :  { %2453 = vmatprep.mubr.msk.f32.mxu0 %vm287_vm2, %v64_v30 }
  0x39   :  { %2454 = vmatmul.mubr.msk.f32.gmra.mrb[10].mxu0 %vm287_vm2, %v65_v31 }
  0x3a   :  { %2456 = vmatprep.mubr.msk.f32.mxu0 %vm287_vm2, %v66_v32 }
  0x3d   :  { %2457 = vmatmul.mubr.msk.f32.gmra.mrb[12].mxu0 %vm287_vm2, %v67_v33 }
  0x3e   :  { %2459 = vmatprep.mubr.msk.f32.mxu0 %vm287_vm2, %v68_v34 }
  0x41   :  { %2460 = vmatmul.mubr.msk.f32.gmra.mrb[14].mxu0 %vm287_vm2, %v69_v35 }
  0xf8   :  { %v2440_v37 = vpop.f32.mrb[0].mxu0 }
  0xf9   :  { %v402_v38 = vpop.f32.mrb[1].mxu0  ;;  %v2948_v39 = vadd.f32 %v2440_v37, %v2945_v36 }
  0xfa   :  { %v2951_v40 = vadd.f32 %v2945_v36, %v402_v38 }
  0xfb   :  { %v505_v44 = vmax.f32 %v2948_v39, 0.0 }
  0xfc   :  { %v504_v41 = vmax.f32 %v2951_v40, 0.0  ;;  %v2443_v42 = vpop.f32.mrb[2].mxu0 }
  0xfd   :  { %v412_v43 = vpop.f32.mrb[3].mxu0  ;;  %v2956_v45 = vadd.f32 %v2443_v42, %v2945_v36  ;;  %v526_v54 = vsel %vm522_vm3, %v505_v44, 0.0 }
  0xfe   :  { %v2959_v46 = vadd.f32 %v2945_v36, %v412_v43  ;;  %v523_v47 = vsel %vm522_vm3, %v504_v41, 0.0 }
  0xff   :  { %524 = vadd.xlane.f32.xlu0 %v523_v47  ;;  %v507_v52 = vmax.f32 %v2956_v45, 0.0 }
 0x100   :  { %v506_v48 = vmax.f32 %v2959_v46, 0.0  ;;  %v2446_v49 = vpop.f32.mrb[4].mxu0 }
 0x101   :  { %v2966_v50 = vadd.f32 %v2446_v49, %v2945_v36  ;;  %v422_v51 = vpop.f32.mrb[5].mxu0  ;;  %v532_v62 = vsel %vm522_vm3, %v507_v52, 0.0 }
 0x102   :  { %v2970_v53 = vadd.f32 %v2945_v36, %v422_v51  ;;  %v529_v55 = vsel %vm522_vm3, %v506_v48, 0.0 }
 0x103   :  { %527 = vadd.xlane.f32.xlu0 %v526_v54  ;;  %530 = vadd.xlane.f32.xlu1 %v529_v55  ;;  %v509_v58 = vmax.f32 %v2966_v50, 0.0 }
 0x104   :  { %v508_v56 = vmax.f32 %v2970_v53, 0.0  ;;  %v2449_v57 = vpop.f32.mrb[6].mxu0 }
 0x105   :  { %v432_v59 = vpop.f32.mrb[7].mxu0  ;;  %v2981_v60 = vadd.f32 %v2449_v57, %v2945_v36  ;;  %v538_v3 = vsel %vm522_vm3, %v509_v58, 0.0 }
 0x106   :  { %v2984_v61 = vadd.f32 %v2945_v36, %v432_v59  ;;  %v535_v63 = vsel %vm522_vm3, %v508_v56, 0.0 }
 0x107   :  { %533 = vadd.xlane.f32.xlu1 %v532_v62  ;;  %536 = vadd.xlane.f32.xlu0 %v535_v63  ;;  %v511_v4 = vmax.f32 %v2981_v60, 0.0 }
 0x108   :  { %v510_v0 = vmax.f32 %v2984_v61, 0.0  ;;  %v2452_v1 = vpop.f32.mrb[8].mxu0 }
 0x109   :  { %v442_v2 = vpop.f32.mrb[9].mxu0  ;;  %v2998_v5 = vadd.f32 %v2452_v1, %v2945_v36  ;;  %v544_v14 = vsel %vm522_vm3, %v511_v4, 0.0 }
 0x10a   :  { %v3001_v6 = vadd.f32 %v2945_v36, %v442_v2  ;;  %v541_v7 = vsel %vm522_vm3, %v510_v0, 0.0 }
 0x10b   :  { %539 = vadd.xlane.f32.xlu1 %v538_v3  ;;  %542 = vadd.xlane.f32.xlu0 %v541_v7  ;;  %v513_v12 = vmax.f32 %v2998_v5, 0.0 }
 0x10c   :  { %v512_v8 = vmax.f32 %v3001_v6, 0.0  ;;  %v2455_v9 = vpop.f32.mrb[10].mxu0 }
 0x10d   :  { %v3008_v10 = vadd.f32 %v2455_v9, %v2945_v36  ;;  %v452_v11 = vpop.f32.mrb[11].mxu0  ;;  %v550_v22 = vsel %vm522_vm3, %v513_v12, 0.0 }
 0x10e   :  { %v3012_v13 = vadd.f32 %v2945_v36, %v452_v11  ;;  %v547_v15 = vsel %vm522_vm3, %v512_v8, 0.0 }
 0x10f   :  { %545 = vadd.xlane.f32.xlu1 %v544_v14  ;;  %548 = vadd.xlane.f32.xlu0 %v547_v15  ;;  %v515_v18 = vmax.f32 %v3008_v10, 0.0 }
 0x110   :  { %v514_v16 = vmax.f32 %v3012_v13, 0.0  ;;  %v2458_v17 = vpop.f32.mrb[12].mxu0 }
 0x111   :  { %v462_v19 = vpop.f32.mrb[13].mxu0  ;;  %v3023_v20 = vadd.f32 %v2458_v17, %v2945_v36  ;;  %v556_v27 = vsel %vm522_vm3, %v515_v18, 0.0 }
 0x112   :  { %v3026_v21 = vadd.f32 %v2945_v36, %v462_v19  ;;  %v553_v23 = vsel %vm522_vm3, %v514_v16, 0.0 }
 0x113   :  { %551 = vadd.xlane.f32.xlu1 %v550_v22  ;;  %554 = vadd.xlane.f32.xlu0 %v553_v23  ;;  %v517_v28 = vmax.f32 %v3023_v20, 0.0 }
 0x114   :  { %v516_v24 = vmax.f32 %v3026_v21, 0.0  ;;  %v2461_v25 = vpop.f32.mrb[14].mxu0 }
 0x115   :  { %v472_v26 = vpop.f32.mrb[15].mxu0  ;;  %v3040_v29 = vadd.f32 %v2461_v25, %v2945_v36  ;;  %v562_v34 = vsel %vm522_vm3, %v517_v28, 0.0 }
 0x116   :  { %v3043_v30 = vadd.f32 %v2945_v36, %v472_v26  ;;  %v559_v31 = vsel %vm522_vm3, %v516_v24, 0.0 }
 0x117   :  { %557 = vadd.xlane.f32.xlu1 %v556_v27  ;;  %560 = vadd.xlane.f32.xlu0 %v559_v31  ;;  %v519_v33 = vmax.f32 %v3040_v29, 0.0 }
 0x118   :  { %v518_v32 = vmax.f32 %v3043_v30, 0.0 }
 0x119   :  { %v568_v36 = vsel %vm522_vm3, %v519_v33, 0.0 }
 0x11a   :  { %v565_v35 = vsel %vm522_vm3, %v518_v32, 0.0 }
 0x11b   :  { %563 = vadd.xlane.f32.xlu1 %v562_v34  ;;  %566 = vadd.xlane.f32.xlu0 %v565_v35 }
 0x11f   :  { %569 = vadd.xlane.f32.xlu1 %v568_v36 }
 0x18c   :  { %v525_v37 = vpop.xlane.xlu0 %524 }
 0x18d   :  { %v572_v38 = vmul.f32 0.03125, %v525_v37 }
 0x18f   :  { %v3061_v42 = vsub.f32 %v504_v41, %v572_v38 }
 0x190   :  { %v528_v43 = vpop.xlane.xlu0 %527  ;;  %v531_v47 = vpop.xlane.xlu1 %530 }
 0x191   :  { %v573_v49 = vmul.f32 0.03125, %v528_v43  ;;  %v574_v51 = vmul.f32 0.03125, %v531_v47  ;;  %v604_v54 = vmul.f32 %v3061_v42, %v3061_v42 }
 0x193   :  { %v3067_v55 = vsub.f32 %v505_v44, %v573_v49  ;;  %v3071_v57 = vsub.f32 %v506_v48, %v574_v51  ;;  %v620_v59 = vsel %vm522_vm3, %v604_v54, 0.0 }
 0x194   :  { %v534_v40 = vpop.xlane.xlu1 %533  ;;  %v537_v41 = vpop.xlane.xlu0 %536  ;;  %621 = vadd.xlane.f32.xlu0 %v620_v59 }
 0x195   :  { %v575_v62 = vmul.f32 0.03125, %v534_v40  ;;  %v576_v63 = vmul.f32 0.03125, %v537_v41  ;;  %v605_v1 = vmul.f32 %v3067_v55, %v3067_v55  ;;  %v606_v2 = vmul.f32 %v3071_v57, %v3071_v57 }
 0x197   :  { %v3080_v39 = vsub.f32 %v507_v52, %v575_v62  ;;  %v3084_v44 = vsub.f32 %v508_v56, %v576_v63  ;;  %v623_v46 = vsel %vm522_vm3, %v605_v1, 0.0  ;;  %v626_v48 = vsel %vm522_vm3, %v606_v2, 0.0 }
 0x198   :  { %v540_v3 = vpop.xlane.xlu1 %539  ;;  %v543_v7 = vpop.xlane.xlu0 %542  ;;  %624 = vadd.xlane.f32.xlu1 %v623_v46  ;;  %627 = vadd.xlane.f32.xlu0 %v626_v48 }
 0x199   :  { %v577_v9 = vmul.f32 0.03125, %v540_v3  ;;  %v578_v11 = vmul.f32 0.03125, %v543_v7  ;;  %v607_v14 = vmul.f32 %v3080_v39, %v3080_v39  ;;  %v608_v45 = vmul.f32 %v3084_v44, %v3084_v44  ;;  %v776_v7 = vld [vmem:[%s4291_s10] sm:$0xff] }
 0x19b   :  { %v3094_v52 = vsub.f32 %v509_v58, %v577_v9  ;;  %v3098_v53 = vsub.f32 %v510_v0, %v578_v11  ;;  %v629_v56 = vsel %vm522_vm3, %v607_v14, 0.0  ;;  %v632_v15 = vsel %vm522_vm3, %v608_v45, 0.0  ;;  %v777_v9 = vld [vmem:[%s4291_s10 + $0x8] sm:$0xff]  ;;  %v778_v11 = vld [vmem:[%s4291_s10 + $0x10] sm:$0xff]  ;;  %v779_v14 = vld [vmem:[%s4291_s10 + $0x18] sm:$0xff] }
 0x19c   :  { %v546_v17 = vpop.xlane.xlu1 %545  ;;  %v549_v19 = vpop.xlane.xlu0 %548  ;;  %630 = vadd.xlane.f32.xlu1 %v629_v56  ;;  %633 = vadd.xlane.f32.xlu0 %v632_v15  ;;  %v2530_v29 = vpack.c.bf16 %v777_v9, %v776_v7  ;;  %v2534_v45 = vpack.c.bf16 %v779_v14, %v778_v11 }
 0x19d   :  { %v579_v22 = vmul.f32 0.03125, %v546_v17  ;;  %v580_v23 = vmul.f32 0.03125, %v549_v19  ;;  %v609_v25 = vmul.f32 %v3094_v52, %v3094_v52  ;;  %v610_v50 = vmul.f32 %v3098_v53, %v3098_v53 }
 0x19e   :  { %2531 = vmatprep.subr.bf16.mxu1 %v2530_v29 }
 0x19f   :  { %v3108_v58 = vsub.f32 %v511_v4, %v579_v22  ;;  %v3112_v61 = vsub.f32 %v512_v8, %v580_v23  ;;  %v635_v0 = vsel %vm522_vm3, %v609_v25, 0.0  ;;  %v638_v26 = vsel %vm522_vm3, %v610_v50, 0.0  ;;  %2533 = vmatpush3.bf16.msra.mxu1 %v2530_v29 }
 0x1a0   :  { %v552_v27 = vpop.xlane.xlu1 %551  ;;  %v555_v31 = vpop.xlane.xlu0 %554  ;;  %636 = vadd.xlane.f32.xlu1 %v635_v0  ;;  %639 = vadd.xlane.f32.xlu0 %v638_v26 }
 0x1a1   :  { %v581_v34 = vmul.f32 0.03125, %v552_v27  ;;  %v582_v35 = vmul.f32 0.03125, %v555_v31  ;;  %v611_v36 = vmul.f32 %v3108_v58, %v3108_v58  ;;  %v612_v60 = vmul.f32 %v3112_v61, %v3112_v61  ;;  %2535 = vmatprep.subr.bf16.mxu1 %v2534_v45 }
 0x1a3   :  { %v3122_v4 = vsub.f32 %v513_v12, %v581_v34  ;;  %v3126_v6 = vsub.f32 %v514_v16, %v582_v35  ;;  %v641_v8 = vsel %vm522_vm3, %v611_v36, 0.0  ;;  %v644_v37 = vsel %vm522_vm3, %v612_v60, 0.0  ;;  %2537 = vmatpush3.bf16.msra.mxu1 %v2534_v45 }
 0x1a4   :  { %v558_v38 = vpop.xlane.xlu1 %557  ;;  %v561_v43 = vpop.xlane.xlu0 %560  ;;  %642 = vadd.xlane.f32.xlu1 %v641_v8  ;;  %645 = vadd.xlane.f32.xlu0 %v644_v37 }
 0x1a5   :  { %v583_v47 = vmul.f32 0.03125, %v558_v38  ;;  %v584_v49 = vmul.f32 0.03125, %v561_v43  ;;  %v613_v51 = vmul.f32 %v3122_v4, %v3122_v4  ;;  %v614_v5 = vmul.f32 %v3126_v6, %v3126_v6 }
 0x1a7   :  { %v3136_v12 = vsub.f32 %v515_v18, %v583_v47  ;;  %v3140_v13 = vsub.f32 %v516_v24, %v584_v49  ;;  %v647_v16 = vsel %vm522_vm3, %v613_v51, 0.0  ;;  %v650_v54 = vsel %vm522_vm3, %v614_v5, 0.0  ;;  %v3186_v51 = vld [vmem:[%s4289_s8] ss:$0 sm:$0xff] }
 0x1a8   :  { %v564_v59 = vpop.xlane.xlu1 %563  ;;  %648 = vadd.xlane.f32.xlu1 %v647_v16  ;;  %651 = vadd.xlane.f32.xlu0 %v650_v54  ;;  %v567_v40 = vpop.xlane.xlu0 %566 }
 0x1a9   :  { %v585_v41 = vmul.f32 0.03125, %v564_v59  ;;  %v586_v62 = vmul.f32 0.03125, %v567_v40  ;;  %v615_v63 = vmul.f32 %v3136_v12, %v3136_v12  ;;  %v616_v10 = vmul.f32 %v3140_v13, %v3140_v13 }
 0x1ab   :  { %v3150_v18 = vsub.f32 %v517_v28, %v585_v41  ;;  %v3154_v21 = vsub.f32 %v518_v32, %v586_v62  ;;  %v653_v24 = vsel %vm522_vm3, %v615_v63, 0.0  ;;  %v656_v1 = vsel %vm522_vm3, %v616_v10, 0.0  ;;  %v3192_v41 = vld [vmem:[%s4290_s9] ss:$0 sm:$0xff] }
 0x1ac   :  { %654 = vadd.xlane.f32.xlu1 %v653_v24  ;;  %v570_v2 = vpop.xlane.xlu1 %569  ;;  %657 = vadd.xlane.f32.xlu0 %v656_v1 }
 0x1ad   :  { %v587_v46 = vmul.f32 0.03125, %v570_v2  ;;  %v617_v48 = vmul.f32 %v3150_v18, %v3150_v18  ;;  %v618_v20 = vmul.f32 %v3154_v21, %v3154_v21 }
 0x1af   :  { %v3164_v28 = vsub.f32 %v519_v33, %v587_v46  ;;  %v659_v30 = vsel %vm522_vm3, %v617_v48, 0.0  ;;  %v662_v32 = vsel %vm522_vm3, %v618_v20, 0.0 }
 0x1b0   :  { %660 = vadd.xlane.f32.xlu1 %v659_v30  ;;  %663 = vadd.xlane.f32.xlu0 %v662_v32 }
 0x1b1   :  { %v619_v3 = vmul.f32 %v3164_v28, %v3164_v28 }
 0x1b3   :  { %v665_v33 = vsel %vm522_vm3, %v619_v3, 0.0 }
 0x1b4   :  { %666 = vadd.xlane.f32.xlu1 %v665_v33 }
 0x221   :  { %v622_v56 = vpop.xlane.xlu0 %621 }
 0x222   :  { %v668_v15 = vmul.f32 0.03125, %v622_v56 }
 0x224   :  { %v684_v17 = vadd.f32 1e-05, %v668_v15 }
 0x225   :  { %v625_v19 = vpop.xlane.xlu1 %624  ;;  %v628_v22 = vpop.xlane.xlu0 %627 }
 0x226   :  { %2566 = vrsqrt.f32 %v684_v17  ;;  %v669_v23 = vmul.f32 0.03125, %v625_v19  ;;  %v670_v25 = vmul.f32 0.03125, %v628_v22 }
 0x228   :  { %v685_v50 = vadd.f32 1e-05, %v669_v23  ;;  %v686_v0 = vadd.f32 1e-05, %v670_v25 }
 0x229   :  { %v631_v26 = vpop.xlane.xlu1 %630  ;;  %v634_v27 = vpop.xlane.xlu0 %633 }
 0x22a   :  { %2568 = vrsqrt.f32 %v685_v50  ;;  %v671_v31 = vmul.f32 0.03125, %v631_v26  ;;  %v672_v34 = vmul.f32 0.03125, %v634_v27 }
 0x22b   :  { %2570 = vrsqrt.f32 %v686_v0 }
 0x22c   :  { %v687_v35 = vadd.f32 1e-05, %v671_v31  ;;  %v688_v36 = vadd.f32 1e-05, %v672_v34 }
 0x22d   :  { %v637_v60 = vpop.xlane.xlu1 %636  ;;  %v640_v8 = vpop.xlane.xlu0 %639 }
 0x22e   :  { %2572 = vrsqrt.f32 %v687_v35  ;;  %v673_v37 = vmul.f32 0.03125, %v637_v60  ;;  %v674_v38 = vmul.f32 0.03125, %v640_v8 }
 0x22f   :  { %2574 = vrsqrt.f32 %v688_v36 }
 0x230   :  { %v2567_v43 = vpop.eup %2566  ;;  %v689_v47 = vadd.f32 1e-05, %v673_v37  ;;  %v690_v49 = vadd.f32 1e-05, %v674_v38 }
 0x231   :  { %v643_v5 = vpop.xlane.xlu1 %642  ;;  %v646_v16 = vpop.xlane.xlu0 %645  ;;  %v716_v54 = vmul.f32 %v2567_v43, %v3061_v42 }
 0x232   :  { %2576 = vrsqrt.f32 %v689_v47  ;;  %v675_v59 = vmul.f32 0.03125, %v643_v5  ;;  %v676_v40 = vmul.f32 0.03125, %v646_v16 }
 0x233   :  { %2578 = vrsqrt.f32 %v690_v49  ;;  %v738_v62 = vmul.f32 %v3186_v51, %v716_v54 }
 0x234   :  { %v2569_v63 = vpop.eup %2568  ;;  %v691_v10 = vadd.f32 1e-05, %v675_v59  ;;  %v692_v24 = vadd.f32 1e-05, %v676_v40 }
 0x235   :  { %v2571_v1 = vpop.eup %2570  ;;  %v649_v2 = vpop.xlane.xlu1 %648  ;;  %v760_v48 = vadd.f32 %v3192_v41, %v738_v62  ;;  %v717_v42 = vmul.f32 %v2569_v63, %v3067_v55 }
 0x236   :  { %v652_v46 = vpop.xlane.xlu0 %651  ;;  %2580 = vrsqrt.f32 %v691_v10  ;;  %v677_v20 = vmul.f32 0.03125, %v649_v2  ;;  %v718_v32 = vmul.f32 %v2571_v1, %v3071_v57 }
 0x237   :  { %v678_v30 = vmul.f32 0.03125, %v652_v46  ;;  %2582 = vrsqrt.f32 %v692_v24  ;;  %2470 = vmatprep.mubr.msk.f32.mxu1 %vm522_vm3, %v760_v48  ;;  %v739_v3 = vmul.f32 %v3186_v51, %v717_v42 }
 0x238   :  { %v2573_v7 = vpop.eup %2572  ;;  %v693_v9 = vadd.f32 1e-05, %v677_v20  ;;  %v740_v33 = vmul.f32 %v3186_v51, %v718_v32 }
 0x239   :  { %v694_v29 = vadd.f32 1e-05, %v678_v30  ;;  %v2575_v11 = vpop.eup %2574  ;;  %v655_v14 = vpop.xlane.xlu1 %654  ;;  %v761_v55 = vadd.f32 %v3192_v41, %v739_v3  ;;  %v719_v56 = vmul.f32 %v2573_v7, %v3080_v39 }
 0x23a   :  { %v658_v45 = vpop.xlane.xlu0 %657  ;;  %2584 = vrsqrt.f32 %v693_v9  ;;  %v679_v15 = vmul.f32 0.03125, %v655_v14  ;;  %v762_v17 = vadd.f32 %v3192_v41, %v740_v33  ;;  %v720_v22 = vmul.f32 %v2575_v11, %v3084_v44 }
 0x23b   :  { %v680_v57 = vmul.f32 0.03125, %v658_v45  ;;  %2586 = vrsqrt.f32 %v694_v29  ;;  %2471 = vmatmul.mubr.msk.f32.vlgmr.msra.gmra.mrb[0].mxu1 %vm522_vm3, %v761_v55  ;;  %v741_v19 = vmul.f32 %v3186_v51, %v719_v56 }
 0x23c   :  { %v2577_v23 = vpop.eup %2576  ;;  %v695_v25 = vadd.f32 1e-05, %v679_v15  ;;  %2473 = vmatprep.mubr.msk.f32.mxu1 %vm522_vm3, %v762_v17  ;;  %v742_v31 = vmul.f32 %v3186_v51, %v720_v22  ;;  %v3260_v17 = vld [vmem:[%s4292_s11] ss:$0 sm:$0xff] }
 0x23d   :  { %v696_v50 = vadd.f32 1e-05, %v680_v57  ;;  %v2579_v0 = vpop.eup %2578  ;;  %v661_v26 = vpop.xlane.xlu1 %660  ;;  %v763_v27 = vadd.f32 %v3192_v41, %v741_v19  ;;  %v721_v34 = vmul.f32 %v2577_v23, %v3094_v52 }
 0x23e   :  { %v664_v39 = vpop.xlane.xlu0 %663  ;;  %2588 = vrsqrt.f32 %v695_v25  ;;  %v681_v35 = vmul.f32 0.03125, %v661_v26  ;;  %v722_v60 = vmul.f32 %v2579_v0, %v3098_v53  ;;  %v764_v44 = vadd.f32 %v3192_v41, %v742_v31 }
 0x23f   :  { %v682_v36 = vmul.f32 0.03125, %v664_v39  ;;  %2590 = vrsqrt.f32 %v696_v50  ;;  %2474 = vmatmul.mubr.msk.f32.gmra.mrb[2].mxu1 %vm522_vm3, %v763_v27  ;;  %v743_v8 = vmul.f32 %v3186_v51, %v721_v34 }
 0x240   :  { %v2581_v37 = vpop.eup %2580  ;;  %v697_v38 = vadd.f32 1e-05, %v681_v35  ;;  %v744_v47 = vmul.f32 %v3186_v51, %v722_v60  ;;  %2476 = vmatprep.mubr.msk.f32.mxu1 %vm522_vm3, %v764_v44 }
 0x241   :  { %v698_v43 = vadd.f32 1e-05, %v682_v36  ;;  %v2583_v49 = vpop.eup %2582  ;;  %v667_v52 = vpop.xlane.xlu1 %666  ;;  %v765_v5 = vadd.f32 %v3192_v41, %v743_v8  ;;  %v723_v53 = vmul.f32 %v2581_v37, %v3108_v58 }
 0x242   :  { %2592 = vrsqrt.f32 %v697_v38  ;;  %v683_v16 = vmul.f32 0.03125, %v667_v52  ;;  %v766_v54 = vadd.f32 %v3192_v41, %v744_v47  ;;  %v724_v59 = vmul.f32 %v2583_v49, %v3112_v61 }
 0x243   :  { %2594 = vrsqrt.f32 %v698_v43  ;;  %2477 = vmatmul.mubr.msk.f32.gmra.mrb[4].mxu1 %vm522_vm3, %v765_v5  ;;  %v745_v40 = vmul.f32 %v3186_v51, %v723_v53 }
 0x244   :  { %v2585_v62 = vpop.eup %2584  ;;  %v699_v63 = vadd.f32 1e-05, %v683_v16  ;;  %2479 = vmatprep.mubr.msk.f32.mxu1 %vm522_vm3, %v766_v54  ;;  %v746_v10 = vmul.f32 %v3186_v51, %v724_v59 }
 0x245   :  { %v2587_v24 = vpop.eup %2586  ;;  %v767_v58 = vadd.f32 %v3192_v41, %v745_v40  ;;  %v725_v1 = vmul.f32 %v2585_v62, %v3122_v4 }
 0x246   :  { %2596 = vrsqrt.f32 %v699_v63  ;;  %v768_v2 = vadd.f32 %v3192_v41, %v746_v10  ;;  %v726_v61 = vmul.f32 %v2587_v24, %v3126_v6 }
 0x247   :  { %2480 = vmatmul.mubr.msk.f32.gmra.mrb[6].mxu1 %vm522_vm3, %v767_v58  ;;  %v747_v46 = vmul.f32 %v3186_v51, %v725_v1 }
 0x248   :  { %v2589_v48 = vpop.eup %2588  ;;  %2482 = vmatprep.mubr.msk.f32.mxu1 %vm522_vm3, %v768_v2  ;;  %v748_v42 = vmul.f32 %v3186_v51, %v726_v61 }
 0x249   :  { %v2591_v20 = vpop.eup %2590  ;;  %v769_v30 = vadd.f32 %v3192_v41, %v747_v46  ;;  %v727_v32 = vmul.f32 %v2589_v48, %v3136_v12 }
 0x24a   :  { %v770_v4 = vadd.f32 %v3192_v41, %v748_v42  ;;  %v728_v3 = vmul.f32 %v2591_v20, %v3140_v13 }
 0x24b   :  { %2483 = vmatmul.mubr.msk.f32.gmra.mrb[8].mxu1 %vm522_vm3, %v769_v30  ;;  %v749_v6 = vmul.f32 %v3186_v51, %v727_v32 }
 0x24c   :  { %v2593_v7 = vpop.eup %2592  ;;  %2485 = vmatprep.mubr.msk.f32.mxu1 %vm522_vm3, %v770_v4  ;;  %v750_v9 = vmul.f32 %v3186_v51, %v728_v3 }
 0x24d   :  { %v2595_v29 = vpop.eup %2594  ;;  %v771_v33 = vadd.f32 %v3192_v41, %v749_v6  ;;  %v729_v11 = vmul.f32 %v2593_v7, %v3150_v18 }
 0x24e   :  { %v772_v12 = vadd.f32 %v3192_v41, %v750_v9  ;;  %v730_v14 = vmul.f32 %v2595_v29, %v3154_v21 }
 0x24f   :  { %2486 = vmatmul.mubr.msk.f32.gmra.mrb[10].mxu1 %vm522_vm3, %v771_v33  ;;  %v751_v13 = vmul.f32 %v3186_v51, %v729_v11 }
 0x250   :  { %v2597_v45 = vpop.eup %2596  ;;  %2488 = vmatprep.mubr.msk.f32.mxu1 %vm522_vm3, %v772_v12  ;;  %v752_v55 = vmul.f32 %v3186_v51, %v730_v14 }
 0x251   :  { %v773_v56 = vadd.f32 %v3192_v41, %v751_v13  ;;  %v731_v15 = vmul.f32 %v2597_v45, %v3164_v28 }
 0x252   :  { %v774_v57 = vadd.f32 %v3192_v41, %v752_v55 }
 0x253   :  { %2489 = vmatmul.mubr.msk.f32.gmra.mrb[12].mxu1 %vm522_vm3, %v773_v56  ;;  %v753_v18 = vmul.f32 %v3186_v51, %v731_v15 }
 0x254   :  { %2491 = vmatprep.mubr.msk.f32.mxu1 %vm522_vm3, %v774_v57 }
 0x255   :  { %v775_v21 = vadd.f32 %v3192_v41, %v753_v18 }
 0x257   :  { %2492 = vmatmul.mubr.msk.f32.gmra.mrb[14].mxu1 %vm522_vm3, %v775_v21 }
 0x30e   :  { %v2472_v19 = vpop.f32.mrb[0].mxu1 }
 0x30f   :  { %v3263_v28 = vadd.f32 %v2472_v19, %v3260_v17  ;;  %v901_v22 = vpop.f32.mrb[1].mxu1  ;;  %v1250_v19 = vld [vmem:[%s4295_s14] sm:$0xff] }
 0x310   :  { %v3266_v23 = vadd.f32 %v3260_v17, %v901_v22  ;;  %v1251_v22 = vld [vmem:[%s4295_s14 + $0x8] sm:$0xff] }
 0x311   :  { %v981_v51 = vmax.f32 %v3263_v28, 0.0 }
 0x312   :  { %v980_v25 = vmax.f32 %v3266_v23, 0.0  ;;  %v2475_v41 = vpop.f32.mrb[2].mxu1 }
 0x313   :  { %v3271_v50 = vadd.f32 %v2475_v41, %v3260_v17  ;;  %v911_v0 = vpop.f32.mrb[3].mxu1  ;;  %v1001_v26 = vsel %vm522_vm3, %v981_v51, 0.0  ;;  %v2538_v41 = vpack.c.bf16 %v1251_v22, %v1250_v19 }
 0x314   :  { %v3277_v39 = vadd.f32 %v3260_v17, %v911_v0  ;;  %1002 = vadd.xlane.f32.xlu1 %v1001_v26  ;;  %v998_v27 = vsel %vm522_vm3, %v980_v25, 0.0 }
 0x315   :  { %v983_v31 = vmax.f32 %v3271_v50, 0.0  ;;  %999 = vadd.xlane.f32.xlu0 %v998_v27  ;;  %2539 = vmatprep.subr.bf16.mxu1 %v2538_v41 }
 0x316   :  { %v982_v34 = vmax.f32 %v3277_v39, 0.0  ;;  %v2478_v35 = vpop.f32.mrb[4].mxu1  ;;  %2541 = vmatpush3.bf16.msra.mxu1 %v2538_v41 }
 0x317   :  { %v3285_v36 = vadd.f32 %v2478_v35, %v3260_v17  ;;  %v921_v60 = vpop.f32.mrb[5].mxu1  ;;  %v1007_v44 = vsel %vm522_vm3, %v983_v31, 0.0 }
 0x318   :  { %v3291_v8 = vadd.f32 %v3260_v17, %v921_v60  ;;  %1008 = vadd.xlane.f32.xlu1 %v1007_v44  ;;  %v1004_v37 = vsel %vm522_vm3, %v982_v34, 0.0 }
 0x319   :  { %v985_v38 = vmax.f32 %v3285_v36, 0.0  ;;  %1005 = vadd.xlane.f32.xlu0 %v1004_v37 }
 0x31a   :  { %v984_v43 = vmax.f32 %v3291_v8, 0.0  ;;  %v2481_v47 = vpop.f32.mrb[6].mxu1 }
 0x31b   :  { %v3299_v49 = vadd.f32 %v2481_v47, %v3260_v17  ;;  %v931_v52 = vpop.f32.mrb[7].mxu1  ;;  %v1013_v5 = vsel %vm522_vm3, %v985_v38, 0.0 }
 0x31c   :  { %v3305_v53 = vadd.f32 %v3260_v17, %v931_v52  ;;  %1014 = vadd.xlane.f32.xlu1 %v1013_v5  ;;  %v1010_v16 = vsel %vm522_vm3, %v984_v43, 0.0 }
 0x31d   :  { %v987_v54 = vmax.f32 %v3299_v49, 0.0  ;;  %1011 = vadd.xlane.f32.xlu0 %v1010_v16 }
 0x31e   :  { %v986_v59 = vmax.f32 %v3305_v53, 0.0  ;;  %v2484_v40 = vpop.f32.mrb[8].mxu1 }
 0x31f   :  { %v3313_v62 = vadd.f32 %v2484_v40, %v3260_v17  ;;  %v941_v63 = vpop.f32.mrb[9].mxu1  ;;  %v1019_v10 = vsel %vm522_vm3, %v987_v54, 0.0 }
 0x320   :  { %v3319_v24 = vadd.f32 %v3260_v17, %v941_v63  ;;  %1020 = vadd.xlane.f32.xlu1 %v1019_v10  ;;  %v1016_v58 = vsel %vm522_vm3, %v986_v59, 0.0 }
 0x321   :  { %v989_v1 = vmax.f32 %v3313_v62, 0.0  ;;  %1017 = vadd.xlane.f32.xlu0 %v1016_v58 }
 0x322   :  { %v988_v2 = vmax.f32 %v3319_v24, 0.0  ;;  %v2487_v61 = vpop.f32.mrb[10].mxu1 }
 0x323   :  { %v3327_v46 = vadd.f32 %v2487_v61, %v3260_v17  ;;  %v951_v48 = vpop.f32.mrb[11].mxu1  ;;  %v1025_v42 = vsel %vm522_vm3, %v989_v1, 0.0 }
 0x324   :  { %v3333_v20 = vadd.f32 %v3260_v17, %v951_v48  ;;  %1026 = vadd.xlane.f32.xlu1 %v1025_v42  ;;  %v1022_v30 = vsel %vm522_vm3, %v988_v2, 0.0 }
 0x325   :  { %v991_v32 = vmax.f32 %v3327_v46, 0.0  ;;  %1023 = vadd.xlane.f32.xlu0 %v1022_v30 }
 0x326   :  { %v990_v4 = vmax.f32 %v3333_v20, 0.0  ;;  %v2490_v3 = vpop.f32.mrb[12].mxu1 }
 0x327   :  { %v3341_v6 = vadd.f32 %v2490_v3, %v3260_v17  ;;  %v961_v7 = vpop.f32.mrb[13].mxu1  ;;  %v1031_v9 = vsel %vm522_vm3, %v991_v32, 0.0 }
 0x328   :  { %v3347_v29 = vadd.f32 %v3260_v17, %v961_v7  ;;  %1032 = vadd.xlane.f32.xlu1 %v1031_v9  ;;  %v1028_v33 = vsel %vm522_vm3, %v990_v4, 0.0 }
 0x329   :  { %v993_v11 = vmax.f32 %v3341_v6, 0.0  ;;  %1029 = vadd.xlane.f32.xlu0 %v1028_v33 }
 0x32a   :  { %v992_v12 = vmax.f32 %v3347_v29, 0.0  ;;  %v2493_v14 = vpop.f32.mrb[14].mxu1 }
 0x32b   :  { %v3355_v13 = vadd.f32 %v2493_v14, %v3260_v17  ;;  %v971_v45 = vpop.f32.mrb[15].mxu1  ;;  %v1037_v55 = vsel %vm522_vm3, %v993_v11, 0.0 }
 0x32c   :  { %v3361_v56 = vadd.f32 %v3260_v17, %v971_v45  ;;  %1038 = vadd.xlane.f32.xlu1 %v1037_v55  ;;  %v1034_v15 = vsel %vm522_vm3, %v992_v12, 0.0 }
 0x32d   :  { %v995_v57 = vmax.f32 %v3355_v13, 0.0  ;;  %1035 = vadd.xlane.f32.xlu0 %v1034_v15  ;;  %v3493_v13 = vld [vmem:[%s4283_s2 + $0x8] sm:$0xff] }
 0x32e   :  { %v994_v18 = vmax.f32 %v3361_v56, 0.0 }
 0x32f   :  { %v1043_v21 = vsel %vm522_vm3, %v995_v57, 0.0 }
 0x330   :  { %1044 = vadd.xlane.f32.xlu1 %v1043_v21  ;;  %v1040_v17 = vsel %vm522_vm3, %v994_v18, 0.0 }
 0x331   :  { %1041 = vadd.xlane.f32.xlu0 %v1040_v17 }
 0x3a1   :  { %v1003_v0 = vpop.xlane.xlu1 %1002 }
 0x3a2   :  { %v1047_v26 = vmul.f32 0.03125, %v1003_v0  ;;  %v1000_v27 = vpop.xlane.xlu0 %999 }
 0x3a3   :  { %v1046_v35 = vmul.f32 0.03125, %v1000_v27 }
 0x3a4   :  { %v3382_v60 = vsub.f32 %v981_v51, %v1047_v26 }
 0x3a5   :  { %v3386_v44 = vsub.f32 %v980_v25, %v1046_v35  ;;  %v1009_v37 = vpop.xlane.xlu1 %1008 }
 0x3a6   :  { %v1049_v47 = vmul.f32 0.03125, %v1009_v37  ;;  %v1006_v52 = vpop.xlane.xlu0 %1005  ;;  %v1079_v5 = vmul.f32 %v3382_v60, %v3382_v60 }
 0x3a7   :  { %v1048_v16 = vmul.f32 0.03125, %v1006_v52  ;;  %v1078_v40 = vmul.f32 %v3386_v44, %v3386_v44 }
 0x3a8   :  { %v3394_v63 = vsub.f32 %v983_v31, %v1049_v47  ;;  %v1097_v28 = vsel %vm522_vm3, %v1079_v5, 0.0 }
 0x3a9   :  { %v3399_v23 = vsub.f32 %v982_v34, %v1048_v16  ;;  %v1015_v51 = vpop.xlane.xlu1 %1014  ;;  %1098 = vadd.xlane.f32.xlu1 %v1097_v28  ;;  %v1094_v25 = vsel %vm522_vm3, %v1078_v40, 0.0 }
 0x3aa   :  { %v1051_v10 = vmul.f32 0.03125, %v1015_v51  ;;  %1095 = vadd.xlane.f32.xlu0 %v1094_v25  ;;  %v1012_v58 = vpop.xlane.xlu0 %1011  ;;  %v1081_v61 = vmul.f32 %v3394_v63, %v3394_v63 }
 0x3ab   :  { %v1050_v48 = vmul.f32 0.03125, %v1012_v58  ;;  %v1080_v50 = vmul.f32 %v3399_v23, %v3399_v23 }
 0x3ac   :  { %v3408_v31 = vsub.f32 %v985_v38, %v1051_v10  ;;  %v1103_v39 = vsel %vm522_vm3, %v1081_v61, 0.0 }
 0x3ad   :  { %v3413_v34 = vsub.f32 %v984_v43, %v1050_v48  ;;  %v1021_v42 = vpop.xlane.xlu1 %1020  ;;  %1104 = vadd.xlane.f32.xlu1 %v1103_v39  ;;  %v1100_v30 = vsel %vm522_vm3, %v1080_v50, 0.0  ;;  %v1476_v39 = vsel %vm1472_vm4, %v3493_v13, -inf }
 0x3ae   :  { %v1053_v3 = vmul.f32 0.03125, %v1021_v42  ;;  %1101 = vadd.xlane.f32.xlu0 %v1100_v30  ;;  %v1018_v7 = vpop.xlane.xlu0 %1017  ;;  %v1083_v9 = vmul.f32 %v3408_v31, %v3408_v31  ;;  %v3509_v30 = vld [vmem:[%s4283_s2 + $0x18] sm:$0xff] }
 0x3af   :  { %v1052_v33 = vmul.f32 0.03125, %v1018_v7  ;;  %v1082_v36 = vmul.f32 %v3413_v34, %v3413_v34  ;;  %v1252_v7 = vld [vmem:[%s4295_s14 + $0x10] sm:$0xff] }
 0x3b0   :  { %v3422_v38 = vsub.f32 %v987_v54, %v1053_v3  ;;  %v1109_v8 = vsel %vm522_vm3, %v1083_v9, 0.0  ;;  %v3514_v3 = vld [vmem:[%s4283_s2 + $0x10] sm:$0xff]  ;;  %v1253_v9 = vld [vmem:[%s4295_s14 + $0x18] sm:$0xff] }
 0x3b1   :  { %v3427_v43 = vsub.f32 %v986_v59, %v1052_v33  ;;  %v1027_v14 = vpop.xlane.xlu1 %1026  ;;  %1110 = vadd.xlane.f32.xlu1 %v1109_v8  ;;  %v1106_v45 = vsel %vm522_vm3, %v1082_v36, 0.0  ;;  %v2542_v33 = vpack.c.bf16 %v1253_v9, %v1252_v7  ;;  %v1482_v36 = vsel %vm1472_vm4, %v3509_v30, -inf }
 0x3b2   :  { %v1055_v55 = vmul.f32 0.03125, %v1027_v14  ;;  %1107 = vadd.xlane.f32.xlu0 %v1106_v45  ;;  %v1024_v15 = vpop.xlane.xlu0 %1023  ;;  %v1085_v21 = vmul.f32 %v3422_v38, %v3422_v38  ;;  %v1479_v8 = vsel %vm1472_vm4, %v3514_v3, -inf  ;;  %v3529_v14 = vld [vmem:[%s4283_s2 + $0x28] sm:$0xff]  ;;  %v3534_v45 = vld [vmem:[%s4283_s2 + $0x20] sm:$0xff] }
 0x3b3   :  { %v1054_v17 = vmul.f32 0.03125, %v1024_v15  ;;  %v1084_v49 = vmul.f32 %v3427_v43, %v3427_v43  ;;  %2543 = vmatprep.subr.bf16.mxu1 %v2542_v33  ;;  %v1485_v15 = vsel %vm1472_vm4, %v3534_v45, -inf }
 0x3b4   :  { %v3436_v54 = vsub.f32 %v989_v1, %v1055_v55  ;;  %v1115_v53 = vsel %vm522_vm3, %v1085_v21, 0.0  ;;  %2545 = vmatpush3.bf16.msra.mxu1 %v2542_v33  ;;  %v1488_v55 = vsel %vm1472_vm4, %v3529_v14, -inf  ;;  %v3543_v21 = vld [vmem:[%s4283_s2 + $0x38] sm:$0xff] }
 0x3b5   :  { %v3441_v59 = vsub.f32 %v988_v2, %v1054_v17  ;;  %v1033_v19 = vpop.xlane.xlu1 %1032  ;;  %1116 = vadd.xlane.f32.xlu1 %v1115_v53  ;;  %v1112_v22 = vsel %vm522_vm3, %v1084_v49, 0.0  ;;  %v3548_v17 = vld [vmem:[%s4283_s2 + $0x30] sm:$0xff]  ;;  %v1494_v49 = vsel %vm1472_vm4, %v3543_v21, -inf }
 0x3b6   :  { %v1057_v41 = vmul.f32 0.03125, %v1033_v19  ;;  %1113 = vadd.xlane.f32.xlu0 %v1112_v22  ;;  %v1030_v0 = vpop.xlane.xlu0 %1029  ;;  %v1087_v26 = vmul.f32 %v3436_v54, %v3436_v54  ;;  %v1491_v53 = vsel %vm1472_vm4, %v3548_v17, -inf  ;;  %v3557_v19 = vld [vmem:[%s4283_s2 + $0x48] sm:$0xff]  ;;  %v3562_v22 = vld [vmem:[%s4283_s2 + $0x40] sm:$0xff] }
 0x3b7   :  { %v1056_v27 = vmul.f32 0.03125, %v1030_v0  ;;  %v1086_v62 = vmul.f32 %v3441_v59, %v3441_v59  ;;  %v1497_v0 = vsel %vm1472_vm4, %v3562_v22, -inf }
 0x3b8   :  { %v3450_v1 = vsub.f32 %v991_v32, %v1057_v41  ;;  %v1121_v24 = vsel %vm522_vm3, %v1087_v26, 0.0  ;;  %v1500_v41 = vsel %vm1472_vm4, %v3557_v19, -inf  ;;  %v3571_v26 = vld [vmem:[%s4283_s2 + $0x58] sm:$0xff] }
 0x3b9   :  { %v3455_v2 = vsub.f32 %v990_v4, %v1056_v27  ;;  %v1039_v35 = vpop.xlane.xlu1 %1038  ;;  %1122 = vadd.xlane.f32.xlu1 %v1121_v24  ;;  %v1118_v37 = vsel %vm522_vm3, %v1086_v62, 0.0  ;;  %v3576_v27 = vld [vmem:[%s4283_s2 + $0x50] sm:$0xff]  ;;  %v1506_v62 = vsel %vm1472_vm4, %v3571_v26, -inf }
 0x3ba   :  { %v1059_v47 = vmul.f32 0.03125, %v1039_v35  ;;  %1119 = vadd.xlane.f32.xlu0 %v1118_v37  ;;  %v1036_v52 = vpop.xlane.xlu0 %1035  ;;  %v1089_v5 = vmul.f32 %v3450_v1, %v3450_v1  ;;  %v1503_v24 = vsel %vm1472_vm4, %v3576_v27, -inf  ;;  %v3585_v35 = vld [vmem:[%s4283_s2 + $0x68] sm:$0xff]  ;;  %v3590_v37 = vld [vmem:[%s4283_s2 + $0x60] sm:$0xff] }
 0x3bb   :  { %v1058_v16 = vmul.f32 0.03125, %v1036_v52  ;;  %v1088_v46 = vmul.f32 %v3455_v2, %v3455_v2  ;;  %v1509_v52 = vsel %vm1472_vm4, %v3590_v37, -inf }
 0x3bc   :  { %v3464_v32 = vsub.f32 %v993_v11, %v1059_v47  ;;  %v1127_v20 = vsel %vm522_vm3, %v1089_v5, 0.0  ;;  %v1512_v47 = vsel %vm1472_vm4, %v3585_v35, -inf  ;;  %v3599_v5 = vld [vmem:[%s4283_s2 + $0x78] sm:$0xff] }
 0x3bd   :  { %v3469_v4 = vsub.f32 %v992_v12, %v1058_v16  ;;  %1128 = vadd.xlane.f32.xlu1 %v1127_v20  ;;  %v1045_v40 = vpop.xlane.xlu1 %1044  ;;  %v1124_v28 = vsel %vm522_vm3, %v1088_v46, 0.0  ;;  %v3604_v16 = vld [vmem:[%s4283_s2 + $0x70] sm:$0xff]  ;;  %v1518_v46 = vsel %vm1472_vm4, %v3599_v5, -inf }
 0x3be   :  { %v1061_v51 = vmul.f32 0.03125, %v1045_v40  ;;  %1125 = vadd.xlane.f32.xlu0 %v1124_v28  ;;  %v1042_v25 = vpop.xlane.xlu0 %1041  ;;  %v1091_v10 = vmul.f32 %v3464_v32, %v3464_v32  ;;  %v1515_v20 = vsel %vm1472_vm4, %v3604_v16, -inf }
 0x3bf   :  { %v1060_v58 = vmul.f32 0.03125, %v1042_v25  ;;  %v1090_v6 = vmul.f32 %v3469_v4, %v3469_v4 }
 0x3c0   :  { %v3478_v11 = vsub.f32 %v995_v57, %v1061_v51  ;;  %v1133_v29 = vsel %vm522_vm3, %v1091_v10, 0.0  ;;  %v3499_v57 = vld [vmem:[%s4283_s2] sm:$0xff] }
 0x3c1   :  { %v3483_v12 = vsub.f32 %v994_v18, %v1060_v58  ;;  %1134 = vadd.xlane.f32.xlu1 %v1133_v29  ;;  %v1130_v61 = vsel %vm522_vm3, %v1090_v6, 0.0  ;;  %v1473_v42 = vsel %vm1472_vm4, %v3499_v57, -inf }
 0x3c2   :  { %1131 = vadd.xlane.f32.xlu0 %v1130_v61  ;;  %v1093_v48 = vmul.f32 %v3478_v11, %v3478_v11 }
 0x3c3   :  { %v1092_v50 = vmul.f32 %v3483_v12, %v3483_v12 }
 0x3c4   :  { %v1139_v56 = vsel %vm522_vm3, %v1093_v48, 0.0 }
 0x3c5   :  { %1140 = vadd.xlane.f32.xlu1 %v1139_v56  ;;  %v1136_v18 = vsel %vm522_vm3, %v1092_v50, 0.0 }
 0x3c6   :  { %1137 = vadd.xlane.f32.xlu0 %v1136_v18 }
 0x3c9   :  { %1477 = vmax.xlane.f32.xlu1 %v1476_v39 }
 0x3ca   :  { %1474 = vmax.xlane.f32.xlu0 %v1473_v42 }
 0x3cd   :  { %1483 = vmax.xlane.f32.xlu1 %v1482_v36 }
 0x3ce   :  { %1480 = vmax.xlane.f32.xlu0 %v1479_v8 }
 0x3d1   :  { %1489 = vmax.xlane.f32.xlu1 %v1488_v55 }
 0x3d2   :  { %1486 = vmax.xlane.f32.xlu0 %v1485_v15 }
 0x3d5   :  { %1495 = vmax.xlane.f32.xlu1 %v1494_v49 }
 0x3d6   :  { %1492 = vmax.xlane.f32.xlu0 %v1491_v53  ;;  %v3613_v53 = vld [vmem:[%s4293_s12] ss:$0 sm:$0xff] }
 0x3d9   :  { %1501 = vmax.xlane.f32.xlu1 %v1500_v41 }
 0x3da   :  { %1498 = vmax.xlane.f32.xlu0 %v1497_v0 }
 0x3dd   :  { %1507 = vmax.xlane.f32.xlu1 %v1506_v62 }
 0x3de   :  { %1504 = vmax.xlane.f32.xlu0 %v1503_v24 }
 0x3e1   :  { %1513 = vmax.xlane.f32.xlu1 %v1512_v47 }
 0x3e2   :  { %1510 = vmax.xlane.f32.xlu0 %v1509_v52 }
 0x3e5   :  { %1519 = vmax.xlane.f32.xlu1 %v1518_v46 }
 0x3e6   :  { %1516 = vmax.xlane.f32.xlu0 %v1515_v20 }
 0x436   :  { %v1099_v40 = vpop.xlane.xlu1 %1098 }
 0x437   :  { %v1143_v28 = vmul.f32 0.03125, %v1099_v40  ;;  %v1096_v51 = vpop.xlane.xlu0 %1095 }
 0x438   :  { %v1142_v25 = vmul.f32 0.03125, %v1096_v51  ;;  %v3621_v51 = vld [vmem:[%s4294_s13] ss:$0 sm:$0xff] }
 0x439   :  { %v1159_v10 = vadd.f32 1e-05, %v1143_v28 }
 0x43a   :  { %v1158_v58 = vadd.f32 1e-05, %v1142_v25  ;;  %v1105_v6 = vpop.xlane.xlu1 %1104 }
 0x43b   :  { %2598 = vrsqrt.f32 %v1159_v10  ;;  %v1145_v29 = vmul.f32 0.03125, %v1105_v6  ;;  %v1102_v61 = vpop.xlane.xlu0 %1101 }
 0x43c   :  { %2600 = vrsqrt.f32 %v1158_v58  ;;  %v1144_v48 = vmul.f32 0.03125, %v1102_v61 }
 0x43d   :  { %v1161_v50 = vadd.f32 1e-05, %v1145_v29 }
 0x43e   :  { %v1160_v56 = vadd.f32 1e-05, %v1144_v48  ;;  %v1111_v18 = vpop.xlane.xlu1 %1110 }
 0x43f   :  { %2602 = vrsqrt.f32 %v1161_v50  ;;  %v1147_v39 = vmul.f32 0.03125, %v1111_v18  ;;  %v1108_v42 = vpop.xlane.xlu0 %1107 }
 0x440   :  { %2604 = vrsqrt.f32 %v1160_v56  ;;  %v1146_v7 = vmul.f32 0.03125, %v1108_v42 }
 0x441   :  { %v1163_v9 = vadd.f32 1e-05, %v1147_v39 }
 0x442   :  { %v1162_v33 = vadd.f32 1e-05, %v1146_v7  ;;  %v1117_v36 = vpop.xlane.xlu1 %1116 }
 0x443   :  { %2606 = vrsqrt.f32 %v1163_v9  ;;  %v1149_v8 = vmul.f32 0.03125, %v1117_v36  ;;  %v1114_v55 = vpop.xlane.xlu0 %1113 }
 0x444   :  { %2608 = vrsqrt.f32 %v1162_v33  ;;  %v1148_v15 = vmul.f32 0.03125, %v1114_v55  ;;  %v1470_v55 = vlaneseq }
 0x445   :  { %v2599_v49 = vpop.eup %2598  ;;  %v1165_v41 = vadd.f32 1e-05, %v1149_v8 }
 0x446   :  { %v2601_v0 = vpop.eup %2600  ;;  %v1191_v62 = vmul.f32 %v2599_v49, %v3382_v60  ;;  %v1164_v24 = vadd.f32 1e-05, %v1148_v15  ;;  %v1123_v47 = vpop.xlane.xlu1 %1122 }
 0x447   :  { %2610 = vrsqrt.f32 %v1165_v41  ;;  %v1151_v52 = vmul.f32 0.03125, %v1123_v47  ;;  %v1120_v46 = vpop.xlane.xlu0 %1119  ;;  %v1190_v20 = vmul.f32 %v2601_v0, %v3386_v44 }
 0x448   :  { %v1213_v40 = vmul.f32 %v3613_v53, %v1191_v62  ;;  %2612 = vrsqrt.f32 %v1164_v24  ;;  %v1150_v28 = vmul.f32 0.03125, %v1120_v46 }
 0x449   :  { %v2603_v25 = vpop.eup %2602  ;;  %v1167_v10 = vadd.f32 1e-05, %v1151_v52  ;;  %v1212_v60 = vmul.f32 %v3613_v53, %v1190_v20 }
 0x44a   :  { %v2605_v58 = vpop.eup %2604  ;;  %v1166_v6 = vadd.f32 1e-05, %v1150_v28  ;;  %v1129_v29 = vpop.xlane.xlu1 %1128  ;;  %v1193_v61 = vmul.f32 %v2603_v25, %v3394_v63  ;;  %v1235_v39 = vadd.f32 %v3621_v51, %v1213_v40  ;;  %v3640_v25 = vand.u32 127, %v1470_v55 }
 0x44b   :  { %2614 = vrsqrt.f32 %v1167_v10  ;;  %v1153_v44 = vmul.f32 0.03125, %v1129_v29  ;;  %v1126_v48 = vpop.xlane.xlu0 %1125  ;;  %v1234_v50 = vadd.f32 %v3621_v51, %v1212_v60  ;;  %v1192_v56 = vmul.f32 %v2605_v58, %v3399_v23 }
 0x44c   :  { %2616 = vrsqrt.f32 %v1166_v6  ;;  %v1152_v18 = vmul.f32 0.03125, %v1126_v48  ;;  %v1215_v42 = vmul.f32 %v3613_v53, %v1193_v61 }
 0x44d   :  { %v2607_v7 = vpop.eup %2606  ;;  %v1169_v9 = vadd.f32 1e-05, %v1153_v44  ;;  %2502 = vmatprep.mubr.msk.f32.mxu1 %vm522_vm3, %v1234_v50  ;;  %v1214_v33 = vmul.f32 %v3613_v53, %v1192_v56 }
 0x44e   :  { %v2609_v63 = vpop.eup %2608  ;;  %v1168_v36 = vadd.f32 1e-05, %v1152_v18  ;;  %v1135_v8 = vpop.xlane.xlu1 %1134  ;;  %2503 = vmatmul.mubr.msk.f32.vlgmr.msra.gmra.mrb[16].mxu1 %vm522_vm3, %v1235_v39  ;;  %v1195_v23 = vmul.f32 %v2607_v7, %v3408_v31  ;;  %v1237_v24 = vadd.f32 %v3621_v51, %v1215_v42 }
 0x44f   :  { %2618 = vrsqrt.f32 %v1169_v9  ;;  %v1155_v15 = vmul.f32 0.03125, %v1135_v8  ;;  %v1132_v49 = vpop.xlane.xlu0 %1131  ;;  %v1236_v41 = vadd.f32 %v3621_v51, %v1214_v33  ;;  %v1194_v0 = vmul.f32 %v2609_v63, %v3413_v34 }
 0x450   :  { %2620 = vrsqrt.f32 %v1168_v36  ;;  %v1154_v62 = vmul.f32 0.03125, %v1132_v49  ;;  %v1217_v47 = vmul.f32 %v3613_v53, %v1195_v23 }
 0x451   :  { %v2611_v52 = vpop.eup %2610  ;;  %v1171_v46 = vadd.f32 1e-05, %v1155_v15  ;;  %2505 = vmatprep.mubr.msk.f32.mxu1 %vm522_vm3, %v1236_v41  ;;  %v1216_v20 = vmul.f32 %v3613_v53, %v1194_v0 }
 0x452   :  { %v2613_v31 = vpop.eup %2612  ;;  %v1170_v40 = vadd.f32 1e-05, %v1154_v62  ;;  %v1141_v28 = vpop.xlane.xlu1 %1140  ;;  %2506 = vmatmul.mubr.msk.f32.gmra.mrb[18].mxu1 %vm522_vm3, %v1237_v24  ;;  %v1197_v34 = vmul.f32 %v2611_v52, %v3422_v38  ;;  %v1239_v61 = vadd.f32 %v3621_v51, %v1217_v47 }
 0x453   :  { %2622 = vrsqrt.f32 %v1171_v46  ;;  %v1157_v10 = vmul.f32 0.03125, %v1141_v28  ;;  %v1138_v60 = vpop.xlane.xlu0 %1137  ;;  %v1238_v58 = vadd.f32 %v3621_v51, %v1216_v20  ;;  %v1196_v6 = vmul.f32 %v2613_v31, %v3427_v43 }
 0x454   :  { %2624 = vrsqrt.f32 %v1170_v40  ;;  %v1156_v29 = vmul.f32 0.03125, %v1138_v60  ;;  %v1219_v44 = vmul.f32 %v3613_v53, %v1197_v34 }
 0x455   :  { %v2615_v48 = vpop.eup %2614  ;;  %v1173_v50 = vadd.f32 1e-05, %v1157_v10  ;;  %2508 = vmatprep.mubr.msk.f32.mxu1 %vm522_vm3, %v1238_v58  ;;  %v1218_v56 = vmul.f32 %v3613_v53, %v1196_v6 }
 0x456   :  { %v2617_v38 = vpop.eup %2616  ;;  %v1172_v18 = vadd.f32 1e-05, %v1156_v29  ;;  %v1478_v39 = vpop.xlane.xlu1 %1477  ;;  %2509 = vmatmul.mubr.msk.f32.gmra.mrb[20].mxu1 %vm522_vm3, %v1239_v61  ;;  %v1199_v42 = vmul.f32 %v2615_v48, %v3436_v54  ;;  %v1241_v9 = vadd.f32 %v3621_v51, %v1219_v44 }
 0x457   :  { %vm1522_vm5 = vcmp.ge.f32.partialorder %v3493_v13, %v1478_v39  ;;  %v1475_v43 = vpop.xlane.xlu0 %1474  ;;  %v1240_v7 = vadd.f32 %v3621_v51, %v1218_v56  ;;  %v1198_v33 = vmul.f32 %v2617_v38, %v3441_v59 }
 0x458   :  { %2626 = vrsqrt.f32 %v1172_v18  ;;  %v1538_v63 = vsel %vm1522_vm5, %v3640_v25, 8  ;;  %vm1521_vm6 = vcmp.ge.f32.partialorder %v3499_v57, %v1475_v43  ;;  %v1221_v36 = vmul.f32 %v3613_v53, %v1199_v42 }
 0x459   :  { %v2619_v8 = vpop.eup %2618  ;;  %2628 = vrsqrt.f32 %v1173_v50  ;;  %v1537_v54 = vsel %vm1521_vm6, %v3640_v25, 8  ;;  %2511 = vmatprep.mubr.msk.f32.mxu1 %vm522_vm3, %v1240_v7  ;;  %v1220_v13 = vmul.f32 %v3613_v53, %v1198_v33  ;;  %v3662_v55 = vsel %vm1472_vm4, %v1538_v63, 2147483647 }
 0x45a   :  { %v2621_v23 = vpop.eup %2620  ;;  %v1484_v59 = vpop.xlane.xlu1 %1483  ;;  %2512 = vmatmul.mubr.msk.f32.gmra.mrb[22].mxu1 %vm522_vm3, %v1241_v9  ;;  %v1570_v15 = vshra.s32 %v3662_v55, 16  ;;  %v1243_v57 = vadd.f32 %v3621_v51, %v1221_v36  ;;  %v3668_v49 = vsel %vm1472_vm4, %v1537_v54, 2147483647  ;;  %v1201_v41 = vmul.f32 %v2619_v8, %v3450_v1 }
 0x45b   :  { %vm1524_vm7 = vcmp.ge.f32.partialorder %v3509_v30, %v1484_v59  ;;  %v1481_v0 = vpop.xlane.xlu0 %1480  ;;  %v1242_v62 = vadd.f32 %v3621_v51, %v1220_v13  ;;  %v1555_v24 = vshra.s32 %v3668_v49, 16  ;;  %v1200_v47 = vmul.f32 %v2621_v23, %v3455_v2 }
 0x45c   :  { %v1540_v52 = vsel %vm1524_vm7, %v3640_v25, 8  ;;  %vm1523_vm8 = vcmp.ge.f32.partialorder %v3514_v3, %v1481_v0  ;;  %v3677_v46 = vcvt.s32.f32 %v1570_v15  ;;  %v1223_v20 = vmul.f32 %v3613_v53, %v1201_v41 }
 0x45d   :  { %v2623_v31 = vpop.eup %2622  ;;  %v1539_v1 = vsel %vm1523_vm8, %v3640_v25, 8  ;;  %2514 = vmatprep.mubr.msk.f32.mxu1 %vm522_vm3, %v1242_v62  ;;  %v3682_v30 = vcvt.s32.f32 %v1555_v24  ;;  %v1222_v40 = vmul.f32 %v3613_v53, %v1200_v47  ;;  %v3686_v28 = vsel %vm1472_vm4, %v1540_v52, 2147483647 }
 0x45e   :  { %v2625_v2 = vpop.eup %2624  ;;  %1573 = vmin.xlane.f32.xlu1 %v3677_v46  ;;  %v1490_v3 = vpop.xlane.xlu1 %1489  ;;  %2515 = vmatmul.mubr.msk.f32.gmra.mrb[24].mxu1 %vm522_vm3, %v1243_v57  ;;  %v1600_v34 = vshra.s32 %v3686_v28, 16  ;;  %v3692_v10 = vsel %vm1472_vm4, %v1539_v1, 2147483647  ;;  %v1245_v6 = vadd.f32 %v3621_v51, %v1223_v20  ;;  %v1203_v38 = vmul.f32 %v2623_v31, %v3464_v32 }
 0x45f   :  { %vm1526_vm9 = vcmp.ge.f32.partialorder %v3529_v14, %v1490_v3  ;;  %1558 = vmin.xlane.f32.xlu0 %v3682_v30  ;;  %v1487_v60 = vpop.xlane.xlu0 %1486  ;;  %v1244_v58 = vadd.f32 %v3621_v51, %v1222_v40  ;;  %v1585_v29 = vshra.s32 %v3692_v10, 16  ;;  %v1202_v48 = vmul.f32 %v2625_v2, %v3469_v4 }
 0x460   :  { %v1542_v61 = vsel %vm1526_vm9, %v3640_v25, 8  ;;  %vm1525_vm10 = vcmp.ge.f32.partialorder %v3534_v45, %v1487_v60  ;;  %v3701_v44 = vcvt.s32.f32 %v1600_v34  ;;  %v1225_v32 = vmul.f32 %v3613_v53, %v1203_v38 }
 0x461   :  { %v1541_v50 = vsel %vm1525_vm10, %v3640_v25, 8  ;;  %2517 = vmatprep.mubr.msk.f32.mxu1 %vm522_vm3, %v1244_v58  ;;  %v3706_v14 = vcvt.s32.f32 %v1585_v29  ;;  %v3709_v56 = vsel %vm1472_vm4, %v1542_v61, 2147483647  ;;  %v1224_v45 = vmul.f32 %v3613_v53, %v1202_v48 }
 0x462   :  { %v2627_v18 = vpop.eup %2626  ;;  %1603 = vmin.xlane.f32.xlu1 %v3701_v44  ;;  %v1496_v39 = vpop.xlane.xlu1 %1495  ;;  %2518 = vmatmul.mubr.msk.f32.gmra.mrb[26].mxu1 %vm522_vm3, %v1245_v6  ;;  %v1630_v4 = vshra.s32 %v3709_v56, 16  ;;  %v3717_v42 = vsel %vm1472_vm4, %v1541_v50, 2147483647  ;;  %v1247_v54 = vadd.f32 %v3621_v51, %v1225_v32 }
 0x463   :  { %v2629_v43 = vpop.eup %2628  ;;  %vm1528_vm11 = vcmp.ge.f32.partialorder %v3543_v21, %v1496_v39  ;;  %1588 = vmin.xlane.f32.xlu0 %v3706_v14  ;;  %v1493_v7 = vpop.xlane.xlu0 %1492  ;;  %v1615_v9 = vshra.s32 %v3717_v42, 16  ;;  %v1246_v63 = vadd.f32 %v3621_v51, %v1224_v45  ;;  %v1204_v13 = vmul.f32 %v2627_v18, %v3483_v12 }
 0x464   :  { %v1544_v33 = vsel %vm1528_vm11, %v3640_v25, 8  ;;  %vm1527_vm12 = vcmp.ge.f32.partialorder %v3548_v17, %v1493_v7  ;;  %v3726_v36 = vcvt.s32.f32 %v1630_v4  ;;  %v1205_v17 = vmul.f32 %v2629_v43, %v3478_v11 }
 0x465   :  { %v1543_v8 = vsel %vm1527_vm12, %v3640_v25, 8  ;;  %v3730_v21 = vcvt.s32.f32 %v1615_v9  ;;  %2520 = vmatprep.mubr.msk.f32.mxu1 %vm522_vm3, %v1246_v63  ;;  %v3736_v59 = vsel %vm1472_vm4, %v1544_v33, 2147483647  ;;  %v1226_v57 = vmul.f32 %v3613_v53, %v1204_v13 }
 0x466   :  { %1633 = vmin.xlane.f32.xlu1 %v3726_v36  ;;  %v1502_v23 = vpop.xlane.xlu1 %1501  ;;  %v3740_v15 = vsel %vm1472_vm4, %v1543_v8, 2147483647  ;;  %2521 = vmatmul.mubr.msk.f32.gmra.mrb[28].mxu1 %vm522_vm3, %v1247_v54  ;;  %v1660_v41 = vshra.s32 %v3736_v59, 16  ;;  %v1227_v11 = vmul.f32 %v3613_v53, %v1205_v17  ;;  %v1554_v17 = vand.u32 65535, %v3668_v49 }
 0x467   :  { %vm1530_vm13 = vcmp.ge.f32.partialorder %v3557_v19, %v1502_v23  ;;  %1618 = vmin.xlane.f32.xlu0 %v3730_v21  ;;  %v1499_v12 = vpop.xlane.xlu0 %1498  ;;  %v1645_v62 = vshra.s32 %v3740_v15, 16  ;;  %v1248_v19 = vadd.f32 %v3621_v51, %v1226_v57  ;;  %v1569_v23 = vand.u32 65535, %v3662_v55 }
 0x468   :  { %v1546_v0 = vsel %vm1530_vm13, %v3640_v25, 8  ;;  %vm1529_vm14 = vcmp.ge.f32.partialorder %v3562_v22, %v1499_v12  ;;  %v3753_v47 = vcvt.s32.f32 %v1660_v41  ;;  %v1249_v31 = vadd.f32 %v3621_v51, %v1227_v11 }
 0x469   :  { %v1545_v24 = vsel %vm1529_vm14, %v3640_v25, 8  ;;  %v3759_v1 = vcvt.s32.f32 %v1645_v62  ;;  %v3762_v22 = vsel %vm1472_vm4, %v1546_v0, 2147483647  ;;  %2523 = vmatprep.mubr.msk.f32.mxu1 %vm522_vm3, %v1248_v19  ;;  %v1571_v57 = vcvt.s32.f32 %v1569_v23 }
 0x46a   :  { %v3756_v52 = vsel %vm1472_vm4, %v1545_v24, 2147483647  ;;  %v1508_v20 = vpop.xlane.xlu1 %1507  ;;  %1663 = vmin.xlane.f32.xlu1 %v3753_v47  ;;  %v1690_v40 = vshra.s32 %v3762_v22, 16  ;;  %2524 = vmatmul.mubr.msk.f32.gmra.mrb[30].mxu1 %vm522_vm3, %v1249_v31  ;;  %v1584_v41 = vand.u32 65535, %v3692_v10  ;;  %v1556_v11 = vcvt.s32.f32 %v1554_v17 }
 0x46b   :  { %vm1532_vm15 = vcmp.ge.f32.partialorder %v3571_v26, %v1508_v20  ;;  %v1505_v53 = vpop.xlane.xlu0 %1504  ;;  %1648 = vmin.xlane.f32.xlu0 %v3759_v1  ;;  %v1675_v51 = vshra.s32 %v3756_v52, 16 }
 0x46c   :  { %v1548_v2 = vsel %vm1532_vm15, %v3640_v25, 8  ;;  %vm1531_vm0 = vcmp.ge.f32.partialorder %v3576_v27, %v1505_v53  ;;  %v3774_v34 = vcvt.s32.f32 %v1690_v40  ;;  %v1586_v49 = vcvt.s32.f32 %v1584_v41 }
 0x46d   :  { %v1547_v3 = vsel %vm1531_vm0, %v3640_v25, 8  ;;  %v3777_v60 = vsel %vm1472_vm4, %v1548_v2, 2147483647  ;;  %v3782_v6 = vcvt.s32.f32 %v1675_v51 }
 0x46e   :  { %v3780_v26 = vsel %vm1472_vm4, %v1547_v3, 2147483647  ;;  %v1514_v58 = vpop.xlane.xlu1 %1513  ;;  %v1720_v29 = vshra.s32 %v3777_v60, 16  ;;  %1693 = vmin.xlane.f32.xlu1 %v3774_v34 }
 0x46f   :  { %vm1534_vm1 = vcmp.ge.f32.partialorder %v3585_v35, %v1514_v58  ;;  %v1511_v27 = vpop.xlane.xlu0 %1510  ;;  %v1705_v61 = vshra.s32 %v3780_v26, 16  ;;  %1678 = vmin.xlane.f32.xlu0 %v3782_v6 }
 0x470   :  { %v1550_v48 = vsel %vm1534_vm1, %v3640_v25, 8  ;;  %vm1533_vm2 = vcmp.ge.f32.partialorder %v3590_v37, %v1511_v27  ;;  %v3791_v50 = vcvt.s32.f32 %v1720_v29 }
 0x471   :  { %v1549_v38 = vsel %vm1533_vm2, %v3640_v25, 8  ;;  %v3794_v18 = vcvt.s32.f32 %v1705_v61  ;;  %v3797_v39 = vsel %vm1472_vm4, %v1550_v48, 2147483647 }
 0x472   :  { %v3800_v35 = vsel %vm1472_vm4, %v1549_v38, 2147483647  ;;  %v1520_v45 = vpop.xlane.xlu1 %1519  ;;  %v1750_v4 = vshra.s32 %v3797_v39, 16  ;;  %1723 = vmin.xlane.f32.xlu1 %v3791_v50 }
 0x473   :  { %vm1536_vm3 = vcmp.ge.f32.partialorder %v3599_v5, %v1520_v45  ;;  %v1517_v37 = vpop.xlane.xlu0 %1516  ;;  %v1735_v43 = vshra.s32 %v3800_v35, 16  ;;  %1708 = vmin.xlane.f32.xlu0 %v3794_v18 }
 0x474   :  { %v1552_v7 = vsel %vm1536_vm3, %v3640_v25, 8  ;;  %vm1535_vm5 = vcmp.ge.f32.partialorder %v3604_v16, %v1517_v37  ;;  %v3809_v32 = vcvt.s32.f32 %v1750_v4 }
 0x475   :  { %v1551_v9 = vsel %vm1535_vm5, %v3640_v25, 8  ;;  %v3812_v33 = vcvt.s32.f32 %v1735_v43  ;;  %v3815_v63 = vsel %vm1472_vm4, %v1552_v7, 2147483647 }
 0x476   :  { %v3818_v5 = vsel %vm1472_vm4, %v1551_v9, 2147483647  ;;  %v1780_v8 = vshra.s32 %v3815_v63, 16  ;;  %1753 = vmin.xlane.f32.xlu1 %v3809_v32 }
 0x477   :  { %v1765_v54 = vshra.s32 %v3818_v5, 16  ;;  %1738 = vmin.xlane.f32.xlu0 %v3812_v33 }
 0x478   :  { %v3824_v16 = vcvt.s32.f32 %v1780_v8 }
 0x479   :  { %v3826_v13 = vcvt.s32.f32 %v1765_v54 }
 0x47a   :  { %1783 = vmin.xlane.f32.xlu1 %v3824_v16 }
 0x47b   :  { %1768 = vmin.xlane.f32.xlu0 %v3826_v13 }
 0x4eb   :  { %v3832_v12 = vpop.xlane.xlu1 %1573 }
 0x4ec   :  { %v3835_v0 = vpop.xlane.xlu0 %1558  ;;  %vm1575_vm6 = vcmp.eq.f32.partialorder %v3677_v46, %v3832_v12  ;;  %v3848_v46 = vld [vmem:[%s4296_s15] ss:$0 sm:$0xff] }
 0x4ed   :  { %v1576_v62 = vsel %vm1575_vm6, %v1571_v57, inf  ;;  %vm1560_vm7 = vcmp.eq.f32.partialorder %v3682_v30, %v3835_v0 }
 0x4ee   :  { %1577 = vmin.xlane.f32.xlu0 %v1576_v62  ;;  %v1561_v24 = vsel %vm1560_vm7, %v1556_v11, inf }
 0x4ef   :  { %1562 = vmin.xlane.f32.xlu1 %v1561_v24  ;;  %v3898_v62 = vpop.xlane.xlu1 %1603 }
 0x4f0   :  { %v3841_v55 = vpop.xlane.xlu0 %1588  ;;  %vm1605_vm9 = vcmp.eq.f32.partialorder %v3701_v44, %v3898_v62 }
 0x4f1   :  { %vm1590_vm8 = vcmp.eq.f32.partialorder %v3706_v14, %v3841_v55 }
 0x4f2   :  { %v1591_v10 = vsel %vm1590_vm8, %v1586_v49, inf }
 0x4f3   :  { %1592 = vmin.xlane.f32.xlu0 %v1591_v10 }
 0x4f4   :  { %v3902_v10 = vpop.xlane.xlu0 %1618 }
 0x4f5   :  { %vm1620_vm10 = vcmp.eq.f32.partialorder %v3730_v21, %v3902_v10 }
 0x521   :  { %v2504_v19 = vpop.f32.mrb[16].mxu1 }
 0x522   :  { %v3851_v20 = vadd.f32 %v2504_v19, %v3848_v46  ;;  %v1375_v30 = vpop.f32.mrb[17].mxu1 }
 0x523   :  { %v3854_v31 = vadd.f32 %v3848_v46, %v1375_v30 }
 0x524   :  { %v1796_v53 = vsel %vm1472_vm4, %v3851_v20, -inf }
 0x525   :  { %v2507_v40 = vpop.f32.mrb[18].mxu1  ;;  %1797 = vmax.xlane.f32.xlu1 %v1796_v53  ;;  %v1793_v14 = vsel %vm1472_vm4, %v3854_v31, -inf }
 0x526   :  { %v3861_v2 = vadd.f32 %v2507_v40, %v3848_v46  ;;  %v1385_v51 = vpop.f32.mrb[19].mxu1  ;;  %1794 = vmax.xlane.f32.xlu0 %v1793_v14 }
 0x527   :  { %v3864_v3 = vadd.f32 %v3848_v46, %v1385_v51 }
 0x528   :  { %v1802_v58 = vsel %vm1472_vm4, %v3861_v2, -inf }
 0x529   :  { %v2510_v29 = vpop.f32.mrb[20].mxu1  ;;  %1803 = vmax.xlane.f32.xlu1 %v1802_v58  ;;  %v1799_v27 = vsel %vm1472_vm4, %v3864_v3, -inf  ;;  %v3914_v58 = vpop.xlane.xlu1 %1633 }
 0x52a   :  { %v3871_v61 = vadd.f32 %v2510_v29, %v3848_v46  ;;  %v1395_v48 = vpop.f32.mrb[21].mxu1  ;;  %1800 = vmax.xlane.f32.xlu0 %v1799_v27  ;;  %vm1635_vm12 = vcmp.eq.f32.partialorder %v3726_v36, %v3914_v58 }
 0x52b   :  { %v3874_v38 = vadd.f32 %v3848_v46, %v1395_v48  ;;  %v1599_v48 = vand.u32 65535, %v3686_v28 }
 0x52c   :  { %v1808_v45 = vsel %vm1472_vm4, %v3871_v61, -inf }
 0x52d   :  { %v2513_v4 = vpop.f32.mrb[22].mxu1  ;;  %1809 = vmax.xlane.f32.xlu1 %v1808_v45  ;;  %v1805_v37 = vsel %vm1472_vm4, %v3874_v38, -inf  ;;  %v3920_v45 = vpop.xlane.xlu0 %1648 }
 0x52e   :  { %v3881_v43 = vadd.f32 %v2513_v4, %v3848_v46  ;;  %v1405_v7 = vpop.f32.mrb[23].mxu1  ;;  %1806 = vmax.xlane.f32.xlu0 %v1805_v37  ;;  %vm1650_vm11 = vcmp.eq.f32.partialorder %v3759_v1, %v3920_v45 }
 0x52f   :  { %v3884_v9 = vadd.f32 %v3848_v46, %v1405_v7 }
 0x530   :  { %v1814_v8 = vsel %vm1472_vm4, %v3881_v43, -inf }
 0x531   :  { %v2516_v54 = vpop.f32.mrb[24].mxu1  ;;  %1815 = vmax.xlane.f32.xlu1 %v1814_v8  ;;  %v1811_v23 = vsel %vm1472_vm4, %v3884_v9, -inf }
 0x532   :  { %v3891_v17 = vadd.f32 %v2516_v54, %v3848_v46  ;;  %v1415_v57 = vpop.f32.mrb[25].mxu1  ;;  %1812 = vmax.xlane.f32.xlu0 %v1811_v23  ;;  %v1614_v54 = vand.u32 65535, %v3717_v42  ;;  %v1601_v23 = vcvt.s32.f32 %v1599_v48  ;;  %v1644_v42 = vand.u32 65535, %v3740_v15 }
 0x533   :  { %v3894_v41 = vadd.f32 %v3848_v46, %v1415_v57  ;;  %v3932_v57 = vpop.xlane.xlu1 %1663 }
 0x534   :  { %v1820_v11 = vsel %vm1472_vm4, %v3891_v17, -inf  ;;  %v1646_v48 = vcvt.s32.f32 %v1644_v42  ;;  %vm1665_vm14 = vcmp.eq.f32.partialorder %v3753_v47, %v3932_v57 }
 0x535   :  { %v2519_v24 = vpop.f32.mrb[26].mxu1  ;;  %1821 = vmax.xlane.f32.xlu1 %v1820_v11  ;;  %v1817_v49 = vsel %vm1472_vm4, %v3894_v41, -inf }
 0x536   :  { %v3905_v19 = vadd.f32 %v2519_v24, %v3848_v46  ;;  %v1425_v30 = vpop.f32.mrb[27].mxu1  ;;  %1818 = vmax.xlane.f32.xlu0 %v1817_v49  ;;  %v3937_v24 = vpop.xlane.xlu0 %1678  ;;  %v1606_v49 = vsel %vm1605_vm9, %v1601_v23, inf }
 0x537   :  { %v3908_v53 = vadd.f32 %v3848_v46, %v1425_v30  ;;  %vm1680_vm13 = vcmp.eq.f32.partialorder %v3782_v6, %v3937_v24 }
 0x538   :  { %v1826_v40 = vsel %vm1472_vm4, %v3905_v19, -inf }
 0x539   :  { %1827 = vmax.xlane.f32.xlu1 %v1826_v40  ;;  %v1823_v14 = vsel %vm1472_vm4, %v3908_v53, -inf  ;;  %v2522_v51 = vpop.f32.mrb[28].mxu1  ;;  %v1616_v40 = vcvt.s32.f32 %v1614_v54 }
 0x53a   :  { %1824 = vmax.xlane.f32.xlu0 %v1823_v14  ;;  %v3917_v29 = vadd.f32 %v2522_v51, %v3848_v46  ;;  %v1435_v27 = vpop.f32.mrb[29].mxu1  ;;  %v1629_v14 = vand.u32 65535, %v3709_v56  ;;  %v3957_v15 = vpop.xlane.xlu0 %1708  ;;  %v1659_v56 = vand.u32 65535, %v3736_v59 }
 0x53b   :  { %v3923_v4 = vadd.f32 %v3848_v46, %v1435_v27  ;;  %v1621_v51 = vsel %vm1620_vm10, %v1616_v40, inf  ;;  %v3950_v27 = vpop.xlane.xlu1 %1693  ;;  %vm1710_vm15 = vcmp.eq.f32.partialorder %v3794_v18, %v3957_v15  ;;  %v1764_v18 = vand.u32 65535, %v3818_v5 }
 0x53c   :  { %v1832_v37 = vsel %vm1472_vm4, %v3917_v29, -inf  ;;  %vm1695_vm0 = vcmp.eq.f32.partialorder %v3774_v34, %v3950_v27 }
 0x53d   :  { %1833 = vmax.xlane.f32.xlu1 %v1832_v37  ;;  %v1829_v7 = vsel %vm1472_vm4, %v3923_v4, -inf  ;;  %v2525_v8 = vpop.f32.mrb[30].mxu1  ;;  %v1631_v37 = vcvt.s32.f32 %v1629_v14 }
 0x53e   :  { %1830 = vmax.xlane.f32.xlu0 %v1829_v7  ;;  %v1445_v28 = vpop.f32.mrb[31].mxu1  ;;  %v3942_v30 = vadd.f32 %v2525_v8, %v3848_v46  ;;  %v1651_v7 = vsel %vm1650_vm11, %v1646_v48, inf  ;;  %v1704_v8 = vand.u32 65535, %v3780_v26  ;;  %v3968_v59 = vpop.xlane.xlu0 %1738  ;;  %v1734_v26 = vand.u32 65535, %v3800_v35 }
 0x53f   :  { %v3935_v11 = vadd.f32 %v3848_v46, %v1445_v28  ;;  %v1674_v46 = vand.u32 65535, %v3756_v52  ;;  %v1636_v1 = vsel %vm1635_vm12, %v1631_v37, inf  ;;  %v1689_v52 = vand.u32 65535, %v3762_v22  ;;  %v3966_v54 = vpop.xlane.xlu1 %1723 }
 0x540   :  { %v1838_v21 = vsel %vm1472_vm4, %v3942_v30, -inf  ;;  %v1661_v28 = vcvt.s32.f32 %v1659_v56  ;;  %v1706_v47 = vcvt.s32.f32 %v1704_v8  ;;  %v1719_v22 = vand.u32 65535, %v3777_v60 }
 0x541   :  { %v1835_v44 = vsel %vm1472_vm4, %v3935_v11, -inf  ;;  %v1676_v36 = vcvt.s32.f32 %v1674_v46  ;;  %vm1740_vm1 = vcmp.eq.f32.partialorder %v3812_v33, %v3968_v59  ;;  %vm1725_vm2 = vcmp.eq.f32.partialorder %v3791_v50, %v3966_v54 }
 0x542   :  { %1607 = vmin.xlane.f32.xlu0 %v1606_v49  ;;  %1836 = vmax.xlane.f32.xlu1 %v1835_v44  ;;  %v1666_v6 = vsel %vm1665_vm14, %v1661_v28, inf  ;;  %v1691_v49 = vcvt.s32.f32 %v1689_v52  ;;  %v1711_v44 = vsel %vm1710_vm15, %v1706_v47, inf  ;;  %v3983_v35 = vpop.xlane.xlu0 %1768  ;;  %v1736_v34 = vcvt.s32.f32 %v1734_v26 }
 0x543   :  { %v1681_v23 = vsel %vm1680_vm13, %v1676_v36, inf  ;;  %v3976_v42 = vpop.xlane.xlu1 %1753  ;;  %v1749_v60 = vand.u32 65535, %v3797_v39  ;;  %v1721_v14 = vcvt.s32.f32 %v1719_v22  ;;  %vm1770_vm3 = vcmp.eq.f32.partialorder %v3826_v13, %v3983_v35 }
 0x544   :  { %v1696_v40 = vsel %vm1695_vm0, %v1691_v49, inf  ;;  %vm1755_vm5 = vcmp.eq.f32.partialorder %v3809_v32, %v3976_v42  ;;  %v1766_v33 = vcvt.s32.f32 %v1764_v18  ;;  %v1779_v50 = vand.u32 65535, %v3815_v63 }
 0x545   :  { %v1751_v46 = vcvt.s32.f32 %v1749_v60  ;;  %v1580_v37 = vcvt.f32.s32 %v3832_v12  ;;  %v1565_v32 = vcvt.f32.s32 %v3835_v0  ;;  %v1595_v52 = vcvt.f32.s32 %v3841_v55 }
 0x546   :  { %1622 = vmin.xlane.f32.xlu0 %v1621_v51  ;;  %1839 = vmax.xlane.f32.xlu1 %v1838_v21  ;;  %v1741_v51 = vsel %vm1740_vm1, %v1736_v34, inf  ;;  %v1726_v21 = vsel %vm1725_vm2, %v1721_v14, inf  ;;  %v1771_v48 = vsel %vm1770_vm3, %v1766_v33, inf  ;;  %v1781_v39 = vcvt.s32.f32 %v1779_v50 }
 0x547   :  { %v3991_v5 = vpop.xlane.xlu1 %1783  ;;  %v1756_v56 = vsel %vm1755_vm5, %v1751_v46, inf  ;;  %v1566_v36 = vshll.u32 %v1565_v32, 16 }
 0x548   :  { %vm1785_vm6 = vcmp.eq.f32.partialorder %v3824_v16, %v3991_v5  ;;  %v1596_v16 = vshll.u32 %v1595_v52, 16 }
 0x549   :  { %v1786_v13 = vsel %vm1785_vm6, %v1781_v39, inf }
 0x54a   :  { %1652 = vmin.xlane.f32.xlu0 %v1651_v7  ;;  %1637 = vmin.xlane.f32.xlu1 %v1636_v1  ;;  %v1581_v1 = vshll.u32 %v1580_v37, 16 }
 0x54e   :  { %1682 = vmin.xlane.f32.xlu0 %v1681_v23  ;;  %1667 = vmin.xlane.f32.xlu1 %v1666_v6 }
 0x552   :  { %1712 = vmin.xlane.f32.xlu0 %v1711_v44  ;;  %1697 = vmin.xlane.f32.xlu1 %v1696_v40 }
 0x556   :  { %1742 = vmin.xlane.f32.xlu0 %v1741_v51  ;;  %1727 = vmin.xlane.f32.xlu1 %v1726_v21 }
 0x55a   :  { %1772 = vmin.xlane.f32.xlu0 %v1771_v48  ;;  %1757 = vmin.xlane.f32.xlu1 %v1756_v56 }
 0x55e   :  { %1787 = vmin.xlane.f32.xlu1 %v1786_v13 }
 0x57b   :  { %v1578_v7 = vpop.xlane.xlu0 %1577 }
 0x57c   :  { %v1579_v63 = vcvt.f32.s32 %v1578_v7  ;;  %v1563_v8 = vpop.xlane.xlu1 %1562 }
 0x57d   :  { %v1564_v28 = vcvt.f32.s32 %v1563_v8 }
 0x57e   :  { %v1582_v23 = vadd.s32 %v1581_v1, %v1579_v63 }
 0x57f   :  { %v1567_v6 = vadd.s32 %v1566_v36, %v1564_v28 }
 0x580   :  { %v1593_v26 = vpop.xlane.xlu0 %1592  ;;  %vm1986_vm7 = vcmp.eq.s32.totalorder %v3640_v25, %v1582_v23 }
 0x581   :  { %v1594_v47 = vcvt.f32.s32 %v1593_v26  ;;  %v2002_v22 = vsel %vm1986_vm7, %v3851_v20, 0.0  ;;  %vm1985_vm8 = vcmp.eq.s32.totalorder %v3640_v25, %v1567_v6 }
 0x582   :  { %v2020_v12 = vsel %vm1472_vm4, %v2002_v22, 0.0  ;;  %v2001_v0 = vsel %vm1985_vm8, %v3854_v31, 0.0 }
 0x583   :  { %v1597_v49 = vadd.s32 %v1596_v16, %v1594_v47  ;;  %2021 = vadd.xlane.f32.xlu0 %v2020_v12  ;;  %v2017_v55 = vsel %vm1472_vm4, %v2001_v0, 0.0 }
 0x584   :  { %2018 = vadd.xlane.f32.xlu1 %v2017_v55 }
 0x585   :  { %vm1987_vm9 = vcmp.eq.s32.totalorder %v3640_v25, %v1597_v49 }
 0x586   :  { %v2003_v44 = vsel %vm1987_vm9, %v3864_v3, 0.0 }
 0x587   :  { %v2023_v40 = vsel %vm1472_vm4, %v2003_v44, 0.0 }
 0x588   :  { %2024 = vadd.xlane.f32.xlu0 %v2023_v40 }
 0x5b2   :  { %v4007_v18 = vpop.xlane.xlu1 %1797 }
 0x5b3   :  { %v1842_v34 = vsub.f32 %v3851_v20, %v4007_v18  ;;  %v4011_v60 = vpop.xlane.xlu0 %1794 }
 0x5b4   :  { %v1841_v0 = vsub.f32 %v3854_v31, %v4011_v60 }
 0x5b5   :  { %v1859_v14 = vmul.f32 1.442695, %v1842_v34 }
 0x5b6   :  { %v4013_v51 = vpop.xlane.xlu1 %1803  ;;  %v1857_v31 = vmul.f32 1.442695, %v1841_v0 }
 0x5b7   :  { %2630 = vpow2.f32 %v1859_v14  ;;  %v1844_v21 = vsub.f32 %v3861_v2, %v4013_v51  ;;  %v4017_v33 = vpop.xlane.xlu0 %1800 }
 0x5b9   :  { %v1863_v50 = vmul.f32 1.442695, %v1844_v21  ;;  %v1610_v21 = vcvt.f32.s32 %v3898_v62 }
 0x5ba   :  { %v4019_v46 = vpop.xlane.xlu1 %1809 }
 0x5bb   :  { %2632 = vpow2.f32 %v1863_v50  ;;  %v1846_v48 = vsub.f32 %v3871_v61, %v4019_v46  ;;  %v4023_v56 = vpop.xlane.xlu0 %1806  ;;  %v1611_v62 = vshll.u32 %v1610_v21, 16 }
 0x5bd   :  { %v1867_v20 = vmul.f32 1.442695, %v1846_v48  ;;  %v1843_v48 = vsub.f32 %v3864_v3, %v4017_v33 }
 0x5be   :  { %v4025_v39 = vpop.xlane.xlu1 %1815 }
 0x5bf   :  { %2634 = vpow2.f32 %v1867_v20  ;;  %v1848_v13 = vsub.f32 %v3881_v43, %v4025_v39  ;;  %v4029_v37 = vpop.xlane.xlu0 %1812 }
 0x5c1   :  { %v2631_v32 = vpop.eup %2630  ;;  %v1871_v7 = vmul.f32 1.442695, %v1848_v13 }
 0x5c2   :  { %v4031_v1 = vpop.xlane.xlu1 %1821  ;;  %v1892_v63 = vsel %vm1472_vm4, %v2631_v32, 0.0  ;;  %v1625_v32 = vcvt.f32.s32 %v3902_v10  ;;  %v1847_v10 = vsub.f32 %v3884_v9, %v4029_v37 }
 0x5c3   :  { %2636 = vpow2.f32 %v1871_v7  ;;  %v1850_v8 = vsub.f32 %v3891_v17, %v4031_v1  ;;  %1893 = vadd.xlane.f32.xlu1 %v1892_v63  ;;  %v4036_v36 = vpop.xlane.xlu0 %1818  ;;  %v1845_v7 = vsub.f32 %v3874_v38, %v4023_v56 }
 0x5c5   :  { %v2633_v52 = vpop.eup %2632  ;;  %v1875_v28 = vmul.f32 1.442695, %v1850_v8 }
 0x5c6   :  { %v4038_v23 = vpop.xlane.xlu1 %1827  ;;  %v1898_v6 = vsel %vm1472_vm4, %v2633_v52, 0.0 }
 0x5c7   :  { %2638 = vpow2.f32 %v1875_v28  ;;  %v1852_v26 = vsub.f32 %v3905_v19, %v4038_v23  ;;  %1899 = vadd.xlane.f32.xlu1 %v1898_v6  ;;  %v4043_v16 = vpop.xlane.xlu0 %1824 }
 0x5c8   :  { %v1851_v47 = vsub.f32 %v3908_v53, %v4043_v16 }
 0x5c9   :  { %v2635_v22 = vpop.eup %2634  ;;  %v1879_v12 = vmul.f32 1.442695, %v1852_v26  ;;  %v1861_v26 = vmul.f32 1.442695, %v1843_v48 }
 0x5ca   :  { %v1877_v49 = vmul.f32 1.442695, %v1851_v47  ;;  %v1904_v55 = vsel %vm1472_vm4, %v2635_v22, 0.0  ;;  %v4050_v44 = vpop.xlane.xlu1 %1833  ;;  %v1626_v22 = vshll.u32 %v1625_v32, 16 }
 0x5cb   :  { %2640 = vpow2.f32 %v1879_v12  ;;  %1905 = vadd.xlane.f32.xlu1 %v1904_v55  ;;  %v1854_v40 = vsub.f32 %v3917_v29, %v4050_v44  ;;  %v4054_v34 = vpop.xlane.xlu0 %1830  ;;  %v1865_v12 = vmul.f32 1.442695, %v1845_v7  ;;  %v1869_v7 = vmul.f32 1.442695, %v1847_v10 }
 0x5cc   :  { %2642 = vpow2.f32 %v1877_v49  ;;  %v1853_v50 = vsub.f32 %v3923_v4, %v4054_v34 }
 0x5cd   :  { %v2637_v14 = vpop.eup %2636  ;;  %v1883_v20 = vmul.f32 1.442695, %v1854_v40 }
 0x5ce   :  { %v1910_v13 = vsel %vm1472_vm4, %v2637_v14, 0.0  ;;  %v1881_v52 = vmul.f32 1.442695, %v1853_v50 }
 0x5cf   :  { %1911 = vadd.xlane.f32.xlu1 %v1910_v13  ;;  %v1608_v63 = vpop.xlane.xlu0 %1607  ;;  %2644 = vpow2.f32 %v1883_v20  ;;  %v4065_v28 = vpop.xlane.xlu1 %1836 }
 0x5d0   :  { %v1609_v6 = vcvt.f32.s32 %v1608_v63  ;;  %2646 = vpow2.f32 %v1857_v31  ;;  %v1855_v55 = vsub.f32 %v3935_v11, %v4065_v28 }
 0x5d1   :  { %v2639_v8 = vpop.eup %2638  ;;  %2648 = vpow2.f32 %v1881_v52 }
 0x5d2   :  { %v1916_v3 = vsel %vm1472_vm4, %v2639_v8, 0.0  ;;  %v1612_v47 = vadd.s32 %v1611_v62, %v1609_v6  ;;  %2650 = vpow2.f32 %v1861_v26  ;;  %v1885_v63 = vmul.f32 1.442695, %v1855_v55 }
 0x5d3   :  { %1917 = vadd.xlane.f32.xlu1 %v1916_v3  ;;  %v1623_v0 = vpop.xlane.xlu0 %1622  ;;  %v4072_v40 = vpop.xlane.xlu1 %1839  ;;  %2652 = vpow2.f32 %v1865_v12  ;;  %v1849_v62 = vsub.f32 %v3894_v41, %v4036_v36  ;;  %v1730_v55 = vcvt.f32.s32 %v3966_v54  ;;  %v1760_v54 = vcvt.f32.s32 %v3976_v42 }
 0x5d4   :  { %v1624_v14 = vcvt.f32.s32 %v1623_v0  ;;  %vm1988_vm10 = vcmp.eq.s32.totalorder %v3640_v25, %v1612_v47  ;;  %v1856_v21 = vsub.f32 %v3942_v30, %v4072_v40 }
 0x5d5   :  { %v2641_v49 = vpop.eup %2640  ;;  %v2004_v31 = vsel %vm1988_vm10, %v3861_v2, 0.0  ;;  %v1873_v12 = vmul.f32 1.442695, %v1849_v62 }
 0x5d6   :  { %v1922_v50 = vsel %vm1472_vm4, %v2641_v49, 0.0  ;;  %v2643_v48 = vpop.eup %2642  ;;  %v1627_v20 = vadd.s32 %v1626_v22, %v1624_v14  ;;  %v2026_v13 = vsel %vm1472_vm4, %v2004_v31, 0.0  ;;  %v1887_v32 = vmul.f32 1.442695, %v1856_v21 }
 0x5d7   :  { %1923 = vadd.xlane.f32.xlu1 %v1922_v50  ;;  %2027 = vadd.xlane.f32.xlu0 %v2026_v13  ;;  %v1638_v8 = vpop.xlane.xlu1 %1637  ;;  %v1919_v52 = vsel %vm1472_vm4, %v2643_v48, 0.0  ;;  %v1700_v22 = vcvt.f32.s32 %v3950_v27  ;;  %v1653_v50 = vpop.xlane.xlu0 %1652 }
 0x5d8   :  { %vm1989_vm11 = vcmp.eq.s32.totalorder %v3640_v25, %v1627_v20  ;;  %2654 = vpow2.f32 %v1887_v32  ;;  %v1640_v20 = vcvt.f32.s32 %v3914_v58  ;;  %v1639_v62 = vcvt.f32.s32 %v1638_v8 }
 0x5d9   :  { %v2005_v2 = vsel %vm1989_vm11, %v3874_v38, 0.0  ;;  %v2645_v6 = vpop.eup %2644  ;;  %2656 = vpow2.f32 %v1885_v63  ;;  %v1701_v21 = vshll.u32 %v1700_v22, 16  ;;  %v1731_v63 = vshll.u32 %v1730_v55, 16 }
 0x5da   :  { %v2029_v26 = vsel %vm1472_vm4, %v2005_v2, 0.0  ;;  %v2647_v3 = vpop.eup %2646  ;;  %2658 = vpow2.f32 %v1869_v7  ;;  %v1928_v10 = vsel %vm1472_vm4, %v2645_v6, 0.0  ;;  %v1655_v22 = vcvt.f32.s32 %v3920_v45 }
 0x5db   :  { %1920 = vadd.xlane.f32.xlu1 %v1919_v52  ;;  %2030 = vadd.xlane.f32.xlu0 %v2029_v26  ;;  %v4086_v47 = vpop.xlane.xlu1 %1667  ;;  %v2649_v0 = vpop.eup %2648  ;;  %v1889_v49 = vsel %vm1472_vm4, %v2647_v3, 0.0  ;;  %2660 = vpow2.f32 %v1873_v12  ;;  %v1641_v3 = vshll.u32 %v1640_v20, 16  ;;  %v2718_v12 = vmov 0  }
 0x5dc   :  { %v2651_v38 = vpop.eup %2650  ;;  %v1925_v48 = vsel %vm1472_vm4, %v2649_v0, 0.0  ;;  %2564 = vset.pattern.permute.xlu0 %v2718_v12  ;;  %v1683_v0 = vpop.xlane.xlu0 %1682  ;;  %2565 = vset.pattern.permute.xlu1 %v2718_v12  ;;  %v1654_v8 = vcvt.f32.s32 %v1653_v50  ;;  %v1761_v55 = vshll.u32 %v1760_v54, 16 }
 0x5dd   :  { %v2653_v27 = vpop.eup %2652  ;;  %v1895_v13 = vsel %vm1472_vm4, %v2651_v38, 0.0  ;;  %v1642_v42 = vadd.s32 %v1641_v3, %v1639_v62 }
 0x5de   :  { %v1901_v58 = vsel %vm1472_vm4, %v2653_v27, 0.0 }
 0x5df   :  { %1929 = vadd.xlane.f32.xlu1 %v1928_v10  ;;  %1890 = vadd.xlane.f32.xlu0 %v1889_v49  ;;  %v1698_v14 = vpop.xlane.xlu1 %1697  ;;  %vm1990_vm14 = vcmp.eq.s32.totalorder %v3640_v25, %v1642_v42 }
 0x5e0   :  { %v1699_v31 = vcvt.f32.s32 %v1698_v14  ;;  %v1790_v14 = vcvt.f32.s32 %v3991_v5  ;;  %v1713_v62 = vpop.xlane.xlu0 %1712 }
 0x5e2   :  { %v2655_v32 = vpop.eup %2654  ;;  %v1702_v7 = vadd.s32 %v1701_v21, %v1699_v31  ;;  %v1670_v31 = vcvt.f32.s32 %v3932_v57 }
 0x5e3   :  { %1926 = vadd.xlane.f32.xlu1 %v1925_v48  ;;  %1896 = vadd.xlane.f32.xlu0 %v1895_v13  ;;  %v1728_v52 = vpop.xlane.xlu1 %1727  ;;  %v1934_v6 = vsel %vm1472_vm4, %v2655_v32, 0.0  ;;  %v2657_v26 = vpop.eup %2656  ;;  %v1656_v48 = vshll.u32 %v1655_v22, 16  ;;  %v1684_v22 = vcvt.f32.s32 %v1683_v0  ;;  %v1714_v0 = vcvt.f32.s32 %v1713_v62 }
 0x5e4   :  { %v1729_v2 = vcvt.f32.s32 %v1728_v52  ;;  %v2659_v10 = vpop.eup %2658  ;;  %vm1994_vm12 = vcmp.eq.s32.totalorder %v3640_v25, %v1702_v7  ;;  %v1931_v45 = vsel %vm1472_vm4, %v2657_v26, 0.0  ;;  %v1669_v7 = vcvt.f32.s32 %v4086_v47 }
 0x5e5   :  { %v1907_v27 = vsel %vm1472_vm4, %v2659_v10, 0.0  ;;  %v2010_v20 = vsel %vm1994_vm12, %v3891_v17, 0.0  ;;  %v2661_v13 = vpop.eup %2660  ;;  %v1657_v50 = vadd.s32 %v1656_v48, %v1654_v8  ;;  %v1671_v54 = vshll.u32 %v1670_v31, 16 }
 0x5e6   :  { %v1732_v49 = vadd.s32 %v1731_v63, %v1729_v2  ;;  %v1791_v63 = vshll.u32 %v1790_v14, 16  ;;  %v2044_v52 = vsel %vm1472_vm4, %v2010_v20, 0.0  ;;  %v1685_v2 = vcvt.f32.s32 %v3937_v24 }
 0x5e7   :  { %1935 = vadd.xlane.f32.xlu1 %v1934_v6  ;;  %1902 = vadd.xlane.f32.xlu0 %v1901_v58  ;;  %v1758_v38 = vpop.xlane.xlu1 %1757  ;;  %v1913_v17 = vsel %vm1472_vm4, %v2661_v13, 0.0  ;;  %v2006_v47 = vsel %vm1990_vm14, %v3871_v61, 0.0  ;;  %v1672_v3 = vadd.s32 %v1671_v54, %v1669_v7  ;;  %vm1991_vm0 = vcmp.eq.s32.totalorder %v3640_v25, %v1657_v50 }
 0x5e8   :  { %v1759_v21 = vcvt.f32.s32 %v1758_v38  ;;  %vm1996_vm13 = vcmp.eq.s32.totalorder %v3640_v25, %v1732_v49  ;;  %v1686_v12 = vshll.u32 %v1685_v2, 16  ;;  %v1715_v24 = vcvt.f32.s32 %v3957_v15  ;;  %v1743_v49 = vpop.xlane.xlu0 %1742 }
 0x5e9   :  { %v2012_v6 = vsel %vm1996_vm13, %v3905_v19, 0.0  ;;  %v2032_v10 = vsel %vm1472_vm4, %v2006_v47, 0.0  ;;  %v2007_v61 = vsel %vm1991_vm0, %v3884_v9, 0.0  ;;  %vm1992_vm2 = vcmp.eq.s32.totalorder %v3640_v25, %v1672_v3 }
 0x5ea   :  { %v1762_v32 = vadd.s32 %v1761_v55, %v1759_v21  ;;  %v2050_v58 = vsel %vm1472_vm4, %v2012_v6, 0.0  ;;  %v1687_v42 = vadd.s32 %v1686_v12, %v1684_v22  ;;  %v1716_v38 = vshll.u32 %v1715_v24, 16 }
 0x5eb   :  { %1932 = vadd.xlane.f32.xlu1 %v1931_v45  ;;  %1908 = vadd.xlane.f32.xlu0 %v1907_v27  ;;  %v1788_v5 = vpop.xlane.xlu1 %1787  ;;  %v1745_v15 = vcvt.f32.s32 %v3968_v59  ;;  %v2035_v55 = vsel %vm1472_vm4, %v2007_v61, 0.0  ;;  %v2008_v14 = vsel %vm1992_vm2, %v3881_v43, 0.0  ;;  %v1744_v21 = vcvt.f32.s32 %v1743_v49 }
 0x5ec   :  { %v1789_v57 = vcvt.f32.s32 %v1788_v5  ;;  %vm1998_vm15 = vcmp.eq.s32.totalorder %v3640_v25, %v1762_v32  ;;  %v1717_v9 = vadd.s32 %v1716_v38, %v1714_v0  ;;  %vm1993_vm3 = vcmp.eq.s32.totalorder %v3640_v25, %v1687_v42  ;;  %v1773_v45 = vpop.xlane.xlu0 %1772 }
 0x5ed   :  { %v2014_v19 = vsel %vm1998_vm15, %v3917_v29, 0.0  ;;  %v1746_v48 = vshll.u32 %v1745_v15, 16  ;;  %v1775_v27 = vcvt.f32.s32 %v3983_v35  ;;  %v2038_v59 = vsel %vm1472_vm4, %v2008_v14, 0.0 }
 0x5ee   :  { %v1792_v26 = vadd.s32 %v1791_v63, %v1789_v57  ;;  %v2056_v8 = vsel %vm1472_vm4, %v2014_v19, 0.0  ;;  %v2009_v20 = vsel %vm1993_vm3, %v3894_v41, 0.0  ;;  %v1774_v13 = vcvt.f32.s32 %v1773_v45  ;;  %v2084_v19 = vld [vmem:[%s4284_s3 + $0x18] sm:$0xff] }
 0x5ef   :  { %2045 = vadd.xlane.f32.xlu1 %v2044_v52  ;;  %1914 = vadd.xlane.f32.xlu0 %v1913_v17  ;;  %vm1995_vm5 = vcmp.eq.s32.totalorder %v3640_v25, %v1717_v9  ;;  %v1776_v43 = vshll.u32 %v1775_v27, 16  ;;  %v2041_v32 = vsel %vm1472_vm4, %v2009_v20, 0.0 }
 0x5f0   :  { %vm2000_vm1 = vcmp.eq.s32.totalorder %v3640_v25, %v1792_v26  ;;  %v2011_v50 = vsel %vm1995_vm5, %v3908_v53, 0.0 }
 0x5f1   :  { %v2016_v29 = vsel %vm2000_vm1, %v3942_v30, 0.0  ;;  %v1747_v30 = vadd.s32 %v1746_v48, %v1744_v21  ;;  %v1777_v7 = vadd.s32 %v1776_v43, %v1774_v13  ;;  %v2047_v35 = vsel %vm1472_vm4, %v2011_v50, 0.0 }
 0x5f2   :  { %v2062_v31 = vsel %vm1472_vm4, %v2016_v29, 0.0 }
 0x5f3   :  { %2051 = vadd.xlane.f32.xlu1 %v2050_v58  ;;  %2033 = vadd.xlane.f32.xlu0 %v2032_v10  ;;  %vm1997_vm6 = vcmp.eq.s32.totalorder %v3640_v25, %v1747_v30  ;;  %vm1999_vm7 = vcmp.eq.s32.totalorder %v3640_v25, %v1777_v7 }
 0x5f4   :  { %v2013_v5 = vsel %vm1997_vm6, %v3923_v4, 0.0  ;;  %v2015_v63 = vsel %vm1999_vm7, %v3935_v11, 0.0  ;;  %v2082_v11 = vld [vmem:[%s4284_s3 + $0x8] sm:$0xff] }
 0x5f5   :  { %v2053_v41 = vsel %vm1472_vm4, %v2013_v5, 0.0  ;;  %v2059_v62 = vsel %vm1472_vm4, %v2015_v63, 0.0 }
 0x5f7   :  { %2057 = vadd.xlane.f32.xlu1 %v2056_v8  ;;  %2036 = vadd.xlane.f32.xlu0 %v2035_v55 }
 0x5fb   :  { %2063 = vadd.xlane.f32.xlu1 %v2062_v31  ;;  %2039 = vadd.xlane.f32.xlu0 %v2038_v59 }
 0x5ff   :  { %2042 = vadd.xlane.f32.xlu0 %v2041_v32  ;;  %v2081_v32 = vld [vmem:[%s4284_s3] sm:$0xff] }
 0x603   :  { %2048 = vadd.xlane.f32.xlu0 %v2047_v35 }
 0x607   :  { %2054 = vadd.xlane.f32.xlu0 %v2053_v41 }
 0x60b   :  { %2060 = vadd.xlane.f32.xlu0 %v2059_v62 }
 0x610   :  { %v2022_v17 = vpop.xlane.xlu0 %2021 }
 0x611   :  { %v4142_v57 = vpop.xlane.xlu1 %2018 }
 0x615   :  { %v4148_v58 = vpop.xlane.xlu0 %2024 }
 0x650   :  { %v1894_v53 = vpop.xlane.xlu1 %1893 }
 0x651   :  { %2662 = vlog2.f32 %v1894_v53 }
 0x654   :  { %v1900_v52 = vpop.xlane.xlu1 %1899 }
 0x655   :  { %2664 = vlog2.f32 %v1900_v52 }
 0x658   :  { %v1906_v54 = vpop.xlane.xlu1 %1905 }
 0x65b   :  { %v2663_v2 = vpop.eup %2662 }
 0x65c   :  { %v1940_v4 = vmul.f32 0.6931472, %v2663_v2  ;;  %v1912_v6 = vpop.xlane.xlu1 %1911 }
 0x65e   :  { %v1970_v25 = vadd.f32 %v1940_v4, %v4007_v18 }
 0x65f   :  { %v2665_v26 = vpop.eup %2664 }
 0x660   :  { %v2066_v47 = vsub.f32 %v1970_v25, %v2022_v17  ;;  %v1944_v3 = vmul.f32 0.6931472, %v2665_v26  ;;  %v1918_v22 = vpop.xlane.xlu1 %1917  ;;  %v2083_v17 = vld [vmem:[%s4284_s3 + $0x10] sm:$0xff] }
 0x661   :  { %2666 = vlog2.f32 %v1918_v22 }
 0x662   :  { %v2098_v12 = vmul.f32 %v2082_v11, %v2066_v47  ;;  %v1972_v24 = vadd.f32 %v1944_v3, %v4013_v51 }
 0x664   :  { %v1924_v10 = vpop.xlane.xlu1 %1923  ;;  %2136 = vperm.xlu1 %2565, %v2098_v12   ;;  %v2028_v18 = vpop.xlane.xlu0 %2027 }
 0x665   :  { %v2068_v49 = vsub.f32 %v1972_v24, %v2028_v18 }
 0x667   :  { %v2100_v61 = vmul.f32 %v2084_v19, %v2068_v49 }
 0x668   :  { %v1921_v42 = vpop.xlane.xlu1 %1920  ;;  %v4154_v0 = vpop.xlane.xlu0 %2030 }
 0x669   :  { %2146 = vperm.xlu1 %2565, %v2100_v61  }
 0x66b   :  { %v2667_v29 = vpop.eup %2666 }
 0x66c   :  { %v1930_v8 = vpop.xlane.xlu1 %1929  ;;  %v1891_v38 = vpop.xlane.xlu0 %1890  ;;  %v1956_v21 = vmul.f32 0.6931472, %v2667_v29 }
 0x66d   :  { %2668 = vlog2.f32 %v1891_v38 }
 0x66e   :  { %2670 = vlog2.f32 %v1906_v54  ;;  %v1978_v13 = vadd.f32 %v1956_v21, %v4031_v1 }
 0x66f   :  { %2672 = vlog2.f32 %v1924_v10 }
 0x670   :  { %v4156_v51 = vpop.xlane.xlu1 %1926  ;;  %v1897_v15 = vpop.xlane.xlu0 %1896 }
 0x671   :  { %2674 = vlog2.f32 %v1897_v15 }
 0x672   :  { %2676 = vlog2.f32 %v1930_v8 }
 0x674   :  { %v1936_v55 = vpop.xlane.xlu1 %1935  ;;  %v1903_v14 = vpop.xlane.xlu0 %1902 }
 0x675   :  { %2678 = vlog2.f32 %v1903_v14  ;;  %v2085_v14 = vld [vmem:[%s4284_s3 + $0x20] sm:$0xff] }
 0x676   :  { %2680 = vlog2.f32 %v1912_v6 }
 0x677   :  { %v2669_v9 = vpop.eup %2668  ;;  %2682 = vlog2.f32 %v1936_v55  ;;  %v2094_v55 = vld [vmem:[%s4284_s3 + $0x68] sm:$0xff] }
 0x678   :  { %v4158_v45 = vpop.xlane.xlu1 %1932  ;;  %v2671_v31 = vpop.eup %2670  ;;  %v1938_v48 = vmul.f32 0.6931472, %v2669_v9 }
 0x679   :  { %v1909_v27 = vpop.xlane.xlu0 %1908  ;;  %v2673_v59 = vpop.eup %2672  ;;  %v1948_v7 = vmul.f32 0.6931472, %v2671_v31 }
 0x67a   :  { %2684 = vlog2.f32 %v1909_v27  ;;  %v1969_v20 = vadd.f32 %v1938_v48, %v4011_v60  ;;  %v1960_v35 = vmul.f32 0.6931472, %v2673_v59  ;;  %v2090_v60 = vld [vmem:[%s4284_s3 + $0x48] sm:$0xff] }
 0x67b   :  { %v2675_v30 = vpop.eup %2674 }
 0x67c   :  { %v2046_v43 = vpop.xlane.xlu1 %2045  ;;  %v2677_v50 = vpop.eup %2676  ;;  %v2065_v5 = vsub.f32 %v1969_v20, %v4142_v57  ;;  %v1942_v41 = vmul.f32 0.6931472, %v2675_v30  ;;  %v1980_v25 = vadd.f32 %v1960_v35, %v4038_v23  ;;  %v2086_v23 = vld [vmem:[%s4284_s3 + $0x28] sm:$0xff] }
 0x67d   :  { %v1915_v63 = vpop.xlane.xlu0 %1914  ;;  %v2074_v62 = vsub.f32 %v1978_v13, %v2046_v43  ;;  %v1964_v54 = vmul.f32 0.6931472, %v2677_v50 }
 0x67e   :  { %2686 = vlog2.f32 %v1915_v63  ;;  %v1971_v53 = vadd.f32 %v1942_v41, %v4017_v33  ;;  %v2097_v1 = vmul.f32 %v2081_v32, %v2065_v5  ;;  %v1974_v33 = vadd.f32 %v1948_v7, %v4019_v46 }
 0x67f   :  { %v2679_v52 = vpop.eup %2678  ;;  %v2106_v47 = vmul.f32 %v2090_v60, %v2074_v62  ;;  %2688 = vlog2.f32 %v1921_v42  ;;  %v1982_v46 = vadd.f32 %v1964_v54, %v4050_v44  ;;  %v2089_v62 = vld [vmem:[%s4284_s3 + $0x40] sm:$0xff] }
 0x680   :  { %v2052_v2 = vpop.xlane.xlu1 %2051  ;;  %v2681_v4 = vpop.eup %2680  ;;  %v2067_v57 = vsub.f32 %v1971_v53, %v4148_v58  ;;  %v1946_v6 = vmul.f32 0.6931472, %v2679_v52  ;;  %2131 = vperm.xlu0 %2564, %v2097_v1   ;;  %v2092_v58 = vld [vmem:[%s4284_s3 + $0x58] sm:$0xff]  ;;  %2690 = vlog2.f32 %v4156_v51 }
 0x681   :  { %v2034_v26 = vpop.xlane.xlu0 %2033  ;;  %v2683_v11 = vpop.eup %2682  ;;  %v2076_v22 = vsub.f32 %v1980_v25, %v2052_v2  ;;  %v1952_v18 = vmul.f32 0.6931472, %v2681_v4  ;;  %2692 = vlog2.f32 %v4158_v45  ;;  %v2096_v51 = vld [vmem:[%s4284_s3 + $0x78] sm:$0xff]  ;;  %v2087_v45 = vld [vmem:[%s4284_s3 + $0x30] sm:$0xff]  ;;  %v2093_v25 = vld [vmem:[%s4284_s3 + $0x60] sm:$0xff] }
 0x682   :  { %v1973_v3 = vadd.f32 %v1946_v6, %v4023_v56  ;;  %v2070_v12 = vsub.f32 %v1974_v33, %v2034_v26  ;;  %v2099_v24 = vmul.f32 %v2083_v17, %v2067_v57  ;;  %v1968_v49 = vmul.f32 0.6931472, %v2683_v11  ;;  %v2091_v2 = vld [vmem:[%s4284_s3 + $0x50] sm:$0xff] }
 0x683   :  { %v2108_v38 = vmul.f32 %v2092_v58, %v2076_v22 }
 0x684   :  { %v2685_v10 = vpop.eup %2684  ;;  %v2058_v19 = vpop.xlane.xlu1 %2057  ;;  %2176 = vperm.xlu0 %2564, %v2106_v47   ;;  %2141 = vperm.xlu1 %2565, %v2099_v24   ;;  %v2069_v42 = vsub.f32 %v1973_v3, %v4154_v0  ;;  %v2102_v15 = vmul.f32 %v2086_v23, %v2070_v12  ;;  %v1984_v9 = vadd.f32 %v1968_v49, %v4072_v40  ;;  %v2088_v40 = vld [vmem:[%s4284_s3 + $0x38] sm:$0xff]  ;;  %v2095_v47 = vld [vmem:[%s4284_s3 + $0x70] sm:$0xff]  ;;  %v2113_v12 = vld [vmem:[%s4285_s4] sm:$0xff] }
 0x685   :  { %v2037_v56 = vpop.xlane.xlu0 %2036  ;;  %v1950_v61 = vmul.f32 0.6931472, %v2685_v10  ;;  %v2078_v8 = vsub.f32 %v1982_v46, %v2058_v19  ;;  %v1976_v0 = vadd.f32 %v1952_v18, %v4025_v39  ;;  %v2115_v10 = vld [vmem:[%s4285_s4 + $0x10] sm:$0xff] }
 0x686   :  { %v2101_v30 = vmul.f32 %v2085_v14, %v2069_v42 }
 0x687   :  { %v2110_v31 = vmul.f32 %v2094_v55, %v2078_v8  ;;  %v1975_v48 = vadd.f32 %v1950_v61, %v4029_v37  ;;  %v2117_v61 = vld [vmem:[%s4285_s4 + $0x20] sm:$0xff] }
 0x688   :  { %v2687_v29 = vpop.eup %2686  ;;  %v2064_v44 = vpop.xlane.xlu1 %2063  ;;  %2186 = vperm.xlu0 %2564, %v2108_v38   ;;  %2156 = vperm.xlu1 %2565, %v2102_v15  }
 0x689   :  { %v2040_v21 = vpop.xlane.xlu0 %2039  ;;  %v1954_v27 = vmul.f32 0.6931472, %v2687_v29  ;;  %v2080_v59 = vsub.f32 %v1984_v9, %v2064_v44  ;;  %v2689_v13 = vpop.eup %2688  ;;  %v2071_v43 = vsub.f32 %v1975_v48, %v2037_v56  ;;  %v2116_v56 = vld [vmem:[%s4285_s4 + $0x18] sm:$0xff]  ;;  %v2118_v29 = vld [vmem:[%s4285_s4 + $0x28] sm:$0xff] }
 0x68a   :  { %v2072_v20 = vsub.f32 %v1976_v0, %v2040_v21  ;;  %v1958_v7 = vmul.f32 0.6931472, %v2689_v13  ;;  %v2691_v5 = vpop.eup %2690  ;;  %v2119_v0 = vld [vmem:[%s4285_s4 + $0x30] sm:$0xff] }
 0x68b   :  { %v2112_v37 = vmul.f32 %v2096_v51, %v2080_v59  ;;  %v1977_v50 = vadd.f32 %v1954_v27, %v4036_v36  ;;  %v2103_v41 = vmul.f32 %v2087_v45, %v2071_v43  ;;  %v1962_v53 = vmul.f32 0.6931472, %v2691_v5  ;;  %v2693_v36 = vpop.eup %2692 }
 0x68c   :  { %2196 = vperm.xlu0 %2564, %v2110_v31   ;;  %2151 = vperm.xlu1 %2565, %v2101_v30   ;;  %v2104_v32 = vmul.f32 %v2088_v40, %v2072_v20  ;;  %v1979_v60 = vadd.f32 %v1958_v7, %v4043_v16  ;;  %v1966_v17 = vmul.f32 0.6931472, %v2693_v36  ;;  %v2120_v31 = vld [vmem:[%s4285_s4 + $0x38] sm:$0xff]  ;;  %v2121_v20 = vld [vmem:[%s4285_s4 + $0x40] sm:$0xff]  ;;  %v2122_v40 = vld [vmem:[%s4285_s4 + $0x48] sm:$0xff] }
 0x68d   :  { %v2043_v39 = vpop.xlane.xlu0 %2042  ;;  %v1981_v4 = vadd.f32 %v1962_v53, %v4054_v34  ;;  %v2124_v7 = vld [vmem:[%s4285_s4 + $0x58] sm:$0xff]  ;;  %v2126_v36 = vld [vmem:[%s4285_s4 + $0x68] sm:$0xff] }
 0x68e   :  { %v2073_v63 = vsub.f32 %v1977_v50, %v2043_v39  ;;  %v1983_v33 = vadd.f32 %v1966_v17, %v4065_v28  ;;  %v2114_v28 = vld [vmem:[%s4285_s4 + $0x8] sm:$0xff] }
 0x690   :  { %2206 = vperm.xlu0 %2564, %v2112_v37   ;;  %2166 = vperm.xlu1 %2565, %v2104_v32   ;;  %v2105_v52 = vmul.f32 %v2089_v62, %v2073_v63  ;;  %v2123_v32 = vld [vmem:[%s4285_s4 + $0x50] sm:$0xff]  ;;  %v2125_v62 = vld [vmem:[%s4285_s4 + $0x60] sm:$0xff] }
 0x691   :  { %v2049_v35 = vpop.xlane.xlu0 %2048 }
 0x692   :  { %v2075_v54 = vsub.f32 %v1979_v60, %v2049_v35 }
 0x694   :  { %2161 = vperm.xlu1 %2565, %v2103_v41   ;;  %v2107_v57 = vmul.f32 %v2091_v2, %v2075_v54  ;;  %v2127_v2 = vld [vmem:[%s4285_s4 + $0x70] sm:$0xff] }
 0x695   :  { %v2055_v1 = vpop.xlane.xlu0 %2054 }
 0x696   :  { %v2077_v6 = vsub.f32 %v1981_v4, %v2055_v1 }
 0x698   :  { %2171 = vperm.xlu1 %2565, %v2105_v52   ;;  %v2109_v26 = vmul.f32 %v2093_v25, %v2077_v6 }
 0x699   :  { %v2061_v16 = vpop.xlane.xlu0 %2060 }
 0x69a   :  { %v2079_v11 = vsub.f32 %v1983_v33, %v2061_v16 }
 0x69c   :  { %2181 = vperm.xlu1 %2565, %v2107_v57   ;;  %v2111_v3 = vmul.f32 %v2095_v47, %v2079_v11  ;;  %v2128_v57 = vld [vmem:[%s4285_s4 + $0x78] sm:$0xff]  ;;  %s2698_s4 = scalar_lea.vmem %s2254_s19, 32 }
 0x69d   :  { %p2700_p2 = scmp.lt.s32.totalorder %s2698_s4, %s2694_s20 }
 0x69f   :  { %p2701_p3 = por %p2700_p2, %p2699_p1 }
 0x6a0   :  { %2191 = vperm.xlu1 %2565, %v2109_v26  }
 0x6a1   :  { %p2702_p4 = pnand %p2701_p3, %p2695_p0 }
 0x6a4   :  { %2201 = vperm.xlu1 %2565, %v2111_v3  }
 0x6e3   :  { %v2137_v34 = vpop.permute.xlu1 %2136 }
 0x6e4   :  { %v2210_v46 = vmul.f32 %v2137_v34, %v2114_v28 }
 0x6e8   :  { %v2147_v22 = vpop.permute.xlu1 %2146 }
 0x6e9   :  { %v2212_v38 = vmul.f32 %v2147_v22, %v2116_v56 }
 0x6ff   :  { %v2132_v24 = vpop.permute.xlu0 %2131 }
 0x700   :  { %v2209_v23 = vmul.f32 %v2132_v24, %v2113_v12 }
 0x702   :  { %v2225_v49 = vadd.f32 %v2210_v46, %v2209_v23 }
 0x703   :  { %v2142_v58 = vpop.permute.xlu1 %2141  ;;  %v2177_v9 = vpop.permute.xlu0 %2176 }
 0x704   :  { %v2211_v19 = vmul.f32 %v2142_v58, %v2115_v10  ;;  %v2218_v50 = vmul.f32 %v2177_v9, %v2122_v40 }
 0x706   :  { %v2226_v8 = vadd.f32 %v2225_v49, %v2211_v19 }
 0x707   :  { %v2157_v18 = vpop.permute.xlu1 %2156  ;;  %v2187_v39 = vpop.permute.xlu0 %2186 }
 0x708   :  { %v2227_v55 = vadd.f32 %v2226_v8, %v2212_v38  ;;  %v2214_v21 = vmul.f32 %v2157_v18, %v2118_v29  ;;  %v2220_v53 = vmul.f32 %v2187_v39, %v2124_v7 }
 0x70b   :  { %v2152_v42 = vpop.permute.xlu1 %2151  ;;  %v2197_v63 = vpop.permute.xlu0 %2196 }
 0x70c   :  { %v2213_v15 = vmul.f32 %v2152_v42, %v2117_v61  ;;  %v2222_v17 = vmul.f32 %v2197_v63, %v2126_v36 }
 0x70e   :  { %v2228_v14 = vadd.f32 %v2227_v55, %v2213_v15 }
 0x70f   :  { %v2167_v44 = vpop.permute.xlu1 %2166  ;;  %v2207_v6 = vpop.permute.xlu0 %2206 }
 0x710   :  { %v2229_v59 = vadd.f32 %v2228_v14, %v2214_v21  ;;  %v2216_v30 = vmul.f32 %v2167_v44, %v2120_v31  ;;  %v2224_v26 = vmul.f32 %v2207_v6, %v2128_v57 }
 0x713   :  { %v2162_v48 = vpop.permute.xlu1 %2161 }
 0x714   :  { %v2215_v27 = vmul.f32 %v2162_v48, %v2119_v0 }
 0x716   :  { %v2230_v51 = vadd.f32 %v2229_v59, %v2215_v27 }
 0x717   :  { %v2172_v13 = vpop.permute.xlu1 %2171 }
 0x718   :  { %v2217_v43 = vmul.f32 %v2172_v13, %v2121_v20  ;;  %v2231_v37 = vadd.f32 %v2230_v51, %v2216_v30 }
 0x71a   :  { %v2232_v45 = vadd.f32 %v2231_v37, %v2217_v43 }
 0x71b   :  { %v2182_v35 = vpop.permute.xlu1 %2181 }
 0x71c   :  { %v2219_v5 = vmul.f32 %v2182_v35, %v2123_v32  ;;  %v2233_v41 = vadd.f32 %v2232_v45, %v2218_v50 }
 0x71e   :  { %v2234_v60 = vadd.f32 %v2233_v41, %v2219_v5 }
 0x71f   :  { %v2192_v1 = vpop.permute.xlu1 %2191 }
 0x720   :  { %v2221_v52 = vmul.f32 %v2192_v1, %v2125_v62  ;;  %v2235_v54 = vadd.f32 %v2234_v60, %v2220_v53 }
 0x722   :  { %v2236_v4 = vadd.f32 %v2235_v54, %v2221_v52 }
 0x723   :  { %v2202_v25 = vpop.permute.xlu1 %2201 }
 0x724   :  { %v2223_v16 = vmul.f32 %v2202_v25, %v2127_v2  ;;  %v2237_v33 = vadd.f32 %v2236_v4, %v2222_v17 }
 0x726   :  { %v2238_v11 = vadd.f32 %v2237_v33, %v2223_v16 }
 0x728   :  { %v2239_v47 = vadd.f32 %v2238_v11, %v2224_v26 }
 0x72a   :  { %v2240_v3 = vrot.slane %v2239_v47, 4 }
 0x72c   :  { %v2241_v34 = vadd.f32 %v2240_v3, %v2239_v47 }
 0x72e   :  { %v2242_v22 = vrot.slane %v2241_v34, 2 }
 0x730   :  { %v2243_v12 = vadd.f32 %v2242_v22, %v2241_v34 }
 0x732   :  { %v2244_v24 = vrot.slane %v2243_v12, 1 }
 0x734   :  { %v2245_v28 = vadd.f32 %v2244_v24, %v2243_v12 }
 0x736   :  { %2246 = vst [vmem:[#allocation2] sm:$0x1] %v2245_v28 }
 0x737   :  { %2705 = shalt.err (!%p2702_p4)
}
 0x738   :  { %s2706_s21 = scalar_lea.hbm %s4297_s16, 16 }
 0x739   :  { %p2707_p5 = scmp.ne.s32.totalorder %s4297_s16, %s2706_s21  ;;  %p2710_p6 = scmp.lt.u32.totalorder %s2706_s21, %s4297_s16 }
 0x73b   :  { %p2712_p7 = pnand %p2710_p6, %p2707_p5 }
 0x73d   :  { %2715 = shalt.err (!%p2712_p7)
}
 0x73e   :  { %2256 = dma.vmem_to_hbm [thread:$0]  %s2254_s19, 16, %s4297_s16, [#allocation3]  }
 0x73f   :  { %2716 = dma.done.wait [#allocation3], 16  }
 0x740   :  { %2717 = vsyncadd [#allocation3], 4294967280 }
 0x741   :  { %2260 = vsyncpa [#allocation3], 1 }

</bundles_post_ra>
